<compile_context>
chip_gen: v7x
topology: tpu7x:2x2x1
jax: 0.10.0
libtpu: 0.0.40
codegen_flags: <defaults>
</compile_context>

<pallas_src>
import functools

import jax
import jax.numpy as jnp
from jax.experimental import pallas as pl
from jax.experimental.pallas import tpu as pltpu

D_IN = 1024       # brain signal feature dim (nn.Linear(1024, 512))
D_H1 = 512
D_H2 = 256
LM_HIDDEN = 1024  # BART-large hidden size (projection_layer output dim)


def _fused_mlp_kernel(x_ref, w1_ref, b1_ref, w2_ref, b2_ref, w3_ref, b3_ref,
                      o_ref):
    # Matmul operands are bf16 (MXU native); accumulate in f32, bias/ReLU in f32.
    h1 = jnp.dot(x_ref[...], w1_ref[...], preferred_element_type=jnp.float32)
    h1 = jnp.maximum(h1 + b1_ref[...], 0.0)          # Dropout(0.1) is identity in eval
    h2 = jnp.dot(h1.astype(jnp.bfloat16), w2_ref[...],
                 preferred_element_type=jnp.float32)
    h2 = jnp.maximum(h2 + b2_ref[...], 0.0)
    out = jnp.dot(h2.astype(jnp.bfloat16), w3_ref[...],
                  preferred_element_type=jnp.float32)
    o_ref[...] = (out + b3_ref[...]).astype(o_ref.dtype)


def _round_up(x, m):
    return ((x + m - 1) // m) * m


@functools.partial(jax.jit, static_argnames=("tile_m",))
def compressed_brain_translator_forward(brain_signals, params, tile_m=512):
    """brain_signals: (B, S, 1024) f32 -> projected embeddings (B, S, LM_HIDDEN) f32."""
    w1, b1, w2, b2, w3, b3 = (params["w1"], params["b1"], params["w2"],
                              params["b2"], params["w3"], params["b3"])
    B, S, D = brain_signals.shape
    assert D == D_IN
    M = B * S

    # Row tile: large enough to keep the MXU fed, sublane (8) aligned, but no
    # larger than the padded problem so tiny inputs run as one latency-optimal
    # grid step. For M >= 2*tile_m the grid has >=2 blocks -> both v7x TCs used.
    tile = max(8, _round_up(min(tile_m, _round_up(M, 8)), 8))
    M_pad = _round_up(M, tile)
    grid = (M_pad // tile,)

    # bf16 matmul operands; halves weight/activation HBM traffic and doubles
    # MXU rate. Biases stay f32 (added to the f32 accumulator).
    x = brain_signals.reshape(M, D_IN).astype(jnp.bfloat16)
    if M_pad != M:
        # Padded rows produce ReLU(b1)-propagated values but are sliced off below.
        x = jnp.pad(x, ((0, M_pad - M), (0, 0)))
    w1b, w2b, w3b = (w1.astype(jnp.bfloat16), w2.astype(jnp.bfloat16),
                     w3.astype(jnp.bfloat16))
    b1f, b2f, b3f = (b1.astype(jnp.float32), b2.astype(jnp.float32),
                     b3.astype(jnp.float32))

    # Explicit VMEM budget: resident bf16 weights (double-buffered by default,
    # ~3.5 MiB), double-buffered x (bf16) and out (f32) tiles, plus f32
    # intermediates, with 2x headroom. Capped at 56 MiB (under v7x's 64 MiB).
    weights_bytes = 2 * 2 * (D_IN * D_H1 + D_H1 * D_H2 + D_H2 * LM_HIDDEN)
    io_bytes = 2 * (tile * D_IN * 2) + 2 * (tile * LM_HIDDEN * 4)
    inter_bytes = tile * (D_H1 + D_H2 + LM_HIDDEN) * 4
    vmem_limit = int(min(max(2 * (weights_bytes + io_bytes + inter_bytes),
                             32 * 1024 * 1024),
                         56 * 1024 * 1024))

    full = lambda i: (0, 0)  # grid-invariant operands: fetched once, never re-DMA'd

    out = pl.pallas_call(
        _fused_mlp_kernel,
        out_shape=jax.ShapeDtypeStruct((M_pad, LM_HIDDEN), jnp.float32),
        grid_spec=pltpu.PrefetchScalarGridSpec(
            num_scalar_prefetch=0,
            grid=grid,
            in_specs=[
                pl.BlockSpec((tile, D_IN), lambda i: (i, 0)),  # x rows (bf16)
                pl.BlockSpec((D_IN, D_H1), full),              # w1 (bf16)
                pl.BlockSpec((1, D_H1), full),                 # b1 (f32)
                pl.BlockSpec((D_H1, D_H2), full),              # w2 (bf16)
                pl.BlockSpec((1, D_H2), full),                 # b2 (f32)
                pl.BlockSpec((D_H2, LM_HIDDEN), full),         # w3 (bf16)
                pl.BlockSpec((1, LM_HIDDEN), full),            # b3 (f32)
            ],
            out_specs=pl.BlockSpec((tile, LM_HIDDEN), lambda i: (i, 0)),
        ),
        compiler_params=pltpu.CompilerParams(
            dimension_semantics=("parallel",),
            vmem_limit_bytes=vmem_limit),
    )(x, w1b, b1f, w2b, b2f, w3b, b3f)

    return out[:M].reshape(B, S, LM_HIDDEN)


def init_params(key):
    """Deterministic synthetic params; weights stored (in, out) = W_pytorch.T."""
    k1, k2, k3, k4, k5, k6 = jax.random.split(key, 6)
    s1 = 1.0 / jnp.sqrt(D_IN)
    s2 = 1.0 / jnp.sqrt(D_H1)
    s3 = 1.0 / jnp.sqrt(D_H2)
    return {
        "w1": jax.random.uniform(k1, (D_IN, D_H1), jnp.float32, -s1, s1),
        "b1": jax.random.uniform(k2, (1, D_H1), jnp.float32, -s1, s1),
        "w2": jax.random.uniform(k3, (D_H1, D_H2), jnp.float32, -s2, s2),
        "b2": jax.random.uniform(k4, (1, D_H2), jnp.float32, -s2, s2),
        "w3": jax.random.uniform(k5, (D_H2, LM_HIDDEN), jnp.float32, -s3, s3),
        "b3": jax.random.uniform(k6, (1, LM_HIDDEN), jnp.float32, -s3, s3),
    }


def reference_forward(brain_signals, params):
    h1 = jnp.maximum(brain_signals @ params["w1"] + params["b1"], 0.0)
    h2 = jnp.maximum(h1 @ params["w2"] + params["b2"], 0.0)
    return h2 @ params["w3"] + params["b3"]


if __name__ == "__main__":
    key = jax.random.PRNGKey(0)
    k_x, k_p = jax.random.split(key)

    B, S = 2, 8  # small batch / sequence; feature dims are fixed by the module
    brain_signals = jax.random.normal(k_x, (B, S, D_IN), jnp.float32)
    params = init_params(k_p)

    out = compressed_brain_translator_forward(brain_signals, params)
    out = jax.block_until_ready(out)

    ref = reference_forward(brain_signals, params)
    assert out.shape == (B, S, LM_HIDDEN)
    assert bool(jnp.all(jnp.isfinite(out)))
    # bf16 matmul operands with f32 accumulation vs. f32 reference.
    assert jnp.allclose(out, ref, atol=3e-2, rtol=3e-2)

    print("KERNEL_OK")
</pallas_src>

<mosaic_0001>
module attributes {stable_mosaic.version = 11 : i64} {
  func.func @_fused_mlp_kernel(%arg0: i32, %arg1: memref<16x1024xbf16, #tpu.memory_space<vmem>>, %arg2: memref<1024x512xbf16, #tpu.memory_space<vmem>>, %arg3: memref<1x512xf32, #tpu.memory_space<vmem>>, %arg4: memref<512x256xbf16, #tpu.memory_space<vmem>>, %arg5: memref<1x256xf32, #tpu.memory_space<vmem>>, %arg6: memref<256x1024xbf16, #tpu.memory_space<vmem>>, %arg7: memref<1x1024xf32, #tpu.memory_space<vmem>>, %arg8: memref<16x1024xf32, #tpu.memory_space<vmem>>) attributes {dimension_semantics = [#tpu.dimension_semantics<parallel>], iteration_bounds = array<i64: 1>, scalar_prefetch = 0 : i64, scratch_operands = 0 : i64, tpu.core_type = #tpu.core_type<tc>, window_params = [{transform_indices = @transform_0, window_bounds = array<i64: 16, 1024>}, {pipeline_mode = #tpu.pipeline_mode<synchronous>, transform_indices = @transform_1, window_bounds = array<i64: 1024, 512>}, {pipeline_mode = #tpu.pipeline_mode<synchronous>, transform_indices = @transform_2, window_bounds = array<i64: 1, 512>}, {pipeline_mode = #tpu.pipeline_mode<synchronous>, transform_indices = @transform_3, window_bounds = array<i64: 512, 256>}, {pipeline_mode = #tpu.pipeline_mode<synchronous>, transform_indices = @transform_4, window_bounds = array<i64: 1, 256>}, {pipeline_mode = #tpu.pipeline_mode<synchronous>, transform_indices = @transform_5, window_bounds = array<i64: 256, 1024>}, {pipeline_mode = #tpu.pipeline_mode<synchronous>, transform_indices = @transform_6, window_bounds = array<i64: 1, 1024>}, {transform_indices = @transform_7, window_bounds = array<i64: 16, 1024>}]} {
    %c0 = arith.constant 0 : index
    %c0_0 = arith.constant 0 : index
    %0 = vector.load %arg1[%c0, %c0_0] : memref<16x1024xbf16, #tpu.memory_space<vmem>>, vector<16x1024xbf16>
    %c0_1 = arith.constant 0 : index
    %c0_2 = arith.constant 0 : index
    %1 = vector.load %arg2[%c0_1, %c0_2] : memref<1024x512xbf16, #tpu.memory_space<vmem>>, vector<1024x512xbf16>
    %cst = arith.constant dense<0.000000e+00> : vector<16x512xf32>
    %2 = tpu.matmul %0, %1, %cst {dimension_numbers = #tpu.dot_dimension_numbers<[1], [0], [0], [1], [0, 0, 1, 1], [], []>} : vector<16x1024xbf16>, vector<1024x512xbf16>, vector<16x512xf32> -> vector<16x512xf32>
    %c0_3 = arith.constant 0 : index
    %c0_4 = arith.constant 0 : index
    %3 = vector.load %arg3[%c0_3, %c0_4] : memref<1x512xf32, #tpu.memory_space<vmem>>, vector<1x512xf32>
    %4 = vector.broadcast %3 : vector<1x512xf32> to vector<16x512xf32>
    %5 = arith.addf %2, %4 : vector<16x512xf32>
    %cst_5 = arith.constant 0.000000e+00 : f32
    %6 = vector.broadcast %cst_5 : f32 to vector<16x512xf32>
    %7 = arith.maximumf %5, %6 : vector<16x512xf32>
    %8 = arith.truncf %7 : vector<16x512xf32> to vector<16x512xbf16>
    %c0_6 = arith.constant 0 : index
    %c0_7 = arith.constant 0 : index
    %9 = vector.load %arg4[%c0_6, %c0_7] : memref<512x256xbf16, #tpu.memory_space<vmem>>, vector<512x256xbf16>
    %cst_8 = arith.constant dense<0.000000e+00> : vector<16x256xf32>
    %10 = tpu.matmul %8, %9, %cst_8 {dimension_numbers = #tpu.dot_dimension_numbers<[1], [0], [0], [1], [0, 0, 1, 1], [], []>} : vector<16x512xbf16>, vector<512x256xbf16>, vector<16x256xf32> -> vector<16x256xf32>
    %c0_9 = arith.constant 0 : index
    %c0_10 = arith.constant 0 : index
    %11 = vector.load %arg5[%c0_9, %c0_10] : memref<1x256xf32, #tpu.memory_space<vmem>>, vector<1x256xf32>
    %12 = vector.broadcast %11 : vector<1x256xf32> to vector<16x256xf32>
    %13 = arith.addf %10, %12 : vector<16x256xf32>
    %cst_11 = arith.constant 0.000000e+00 : f32
    %14 = vector.broadcast %cst_11 : f32 to vector<16x256xf32>
    %15 = arith.maximumf %13, %14 : vector<16x256xf32>
    %16 = arith.truncf %15 : vector<16x256xf32> to vector<16x256xbf16>
    %c0_12 = arith.constant 0 : index
    %c0_13 = arith.constant 0 : index
    %17 = vector.load %arg6[%c0_12, %c0_13] : memref<256x1024xbf16, #tpu.memory_space<vmem>>, vector<256x1024xbf16>
    %cst_14 = arith.constant dense<0.000000e+00> : vector<16x1024xf32>
    %18 = tpu.matmul %16, %17, %cst_14 {dimension_numbers = #tpu.dot_dimension_numbers<[1], [0], [0], [1], [0, 0, 1, 1], [], []>} : vector<16x256xbf16>, vector<256x1024xbf16>, vector<16x1024xf32> -> vector<16x1024xf32>
    %c0_15 = arith.constant 0 : index
    %c0_16 = arith.constant 0 : index
    %19 = vector.load %arg7[%c0_15, %c0_16] : memref<1x1024xf32, #tpu.memory_space<vmem>>, vector<1x1024xf32>
    %20 = vector.broadcast %19 : vector<1x1024xf32> to vector<16x1024xf32>
    %21 = arith.addf %18, %20 : vector<16x1024xf32>
    %c0_17 = arith.constant 0 : index
    %c0_18 = arith.constant 0 : index
    %22 = vector.load %arg8[%c0_17, %c0_18] : memref<16x1024xf32, #tpu.memory_space<vmem>>, vector<16x1024xf32>
    tpu.vector_store %arg8[%c0_17, %c0_18], %21 {strides = array<i32>} : memref<16x1024xf32, #tpu.memory_space<vmem>>, vector<16x1024xf32>,
    return
  }
  func.func @transform_0(%arg0: i32) -> (i32, i32) {
    %c0_i32 = arith.constant 0 : i32
    %c0_i32_0 = arith.constant 0 : i32
    return %arg0, %c0_i32 : i32, i32
  }
  func.func @transform_1(%arg0: i32) -> (i32, i32) {
    %c0_i32 = arith.constant 0 : i32
    %c0_i32_0 = arith.constant 0 : i32
    %c0_i32_1 = arith.constant 0 : i32
    return %c0_i32, %c0_i32_0 : i32, i32
  }
  func.func @transform_2(%arg0: i32) -> (i32, i32) {
    %c0_i32 = arith.constant 0 : i32
    %c0_i32_0 = arith.constant 0 : i32
    %c0_i32_1 = arith.constant 0 : i32
    return %c0_i32, %c0_i32_0 : i32, i32
  }
  func.func @transform_3(%arg0: i32) -> (i32, i32) {
    %c0_i32 = arith.constant 0 : i32
    %c0_i32_0 = arith.constant 0 : i32
    %c0_i32_1 = arith.constant 0 : i32
    return %c0_i32, %c0_i32_0 : i32, i32
  }
  func.func @transform_4(%arg0: i32) -> (i32, i32) {
    %c0_i32 = arith.constant 0 : i32
    %c0_i32_0 = arith.constant 0 : i32
    %c0_i32_1 = arith.constant 0 : i32
    return %c0_i32, %c0_i32_0 : i32, i32
  }
  func.func @transform_5(%arg0: i32) -> (i32, i32) {
    %c0_i32 = arith.constant 0 : i32
    %c0_i32_0 = arith.constant 0 : i32
    %c0_i32_1 = arith.constant 0 : i32
    return %c0_i32, %c0_i32_0 : i32, i32
  }
  func.func @transform_6(%arg0: i32) -> (i32, i32) {
    %c0_i32 = arith.constant 0 : i32
    %c0_i32_0 = arith.constant 0 : i32
    %c0_i32_1 = arith.constant 0 : i32
    return %c0_i32, %c0_i32_0 : i32, i32
  }
  func.func @transform_7(%arg0: i32) -> (i32, i32) {
    %c0_i32 = arith.constant 0 : i32
    %c0_i32_0 = arith.constant 0 : i32
    return %arg0, %c0_i32 : i32, i32
  }
}

</mosaic_0001>

<bundles_post_ra>
// kernel: compressed_brain_translator_forward.1
= control target key start
LH: loop header
LB: loop body
LE: loop exit
PB: predicated region body
PF: predicated region fallthrough
CT: control target
= control target key end

     0   :  { %s5993_s0 = inlined_call_operand.vmem [shape: bf16[16,1024], index: 0, kind: input, shape index: {}]   ;;  %s5994_s1 = inlined_call_operand.vmem [shape: bf16[1024,512], index: 1, kind: input, shape index: {}]   ;;  %s5995_s2 = inlined_call_operand.vmem [shape: f32[1,512], index: 2, kind: input, shape index: {}]   ;;  %s5996_s3 = inlined_call_operand.vmem [shape: bf16[512,256], index: 3, kind: input, shape index: {}]   ;;  %s5997_s4 = inlined_call_operand.vmem [shape: f32[1,256], index: 4, kind: input, shape index: {}]   ;;  %s5998_s5 = inlined_call_operand.vmem [shape: bf16[256,1024], index: 5, kind: input, shape index: {}]   ;;  %s5999_s6 = inlined_call_operand.vmem [shape: f32[1,1024], index: 6, kind: input, shape index: {}]   ;;  %s6000_s7 = inlined_call_operand.hbm [shape: f32[16,1024], index: 7, kind: output, shape index: {}]  }
   0x1   :  { %v3990_v0 = vld [vmem:[%s5994_s1 + $0x4] ss:$16 sps:$4 sm:$0xff]   ;;  %v3992_v1 = vld [vmem:[%s5994_s1 + $0xc] ss:$16 sps:$4 sm:$0xff]   ;;  %v3994_v2 = vld [vmem:[%s5994_s1] ss:$16 sps:$4 sm:$0xff]  }
   0x2   :  { %1633 = vmatprep.subr.bf16.mxu0 %v3990_v0  ;;  %v3995_v3 = vld [vmem:[%s5994_s1 + $0x8] ss:$16 sps:$4 sm:$0xff]   ;;  %1805 = vmatprep.subr.bf16.mxu1 %v3992_v1  ;;  %v3996_v4 = vld [vmem:[%s5994_s1 + $0x24] ss:$16 sps:$4 sm:$0xff]   ;;  %v3998_v5 = vld [vmem:[%s5994_s1 + $0x2c] ss:$16 sps:$4 sm:$0xff]  }
   0x3   :  { %1634 = vmatpush1.bf16.msra.mxu0 %v3994_v2  ;;  %1806 = vmatpush1.bf16.msra.mxu1 %v3995_v3  ;;  %v4000_v6 = vld [vmem:[%s5994_s1 + $0x20] ss:$16 sps:$4 sm:$0xff]   ;;  %v4001_v7 = vld [vmem:[%s5994_s1 + $0x28] ss:$16 sps:$4 sm:$0xff]   ;;  %v4002_v8 = vld [vmem:[%s5994_s1 + $0x44] ss:$16 sps:$4 sm:$0xff]  }
   0x4   :  { %1635 = vmatprep.subr.bf16.mxu0 %v3996_v4  ;;  %1807 = vmatprep.subr.bf16.mxu1 %v3998_v5  ;;  %v4004_v9 = vld [vmem:[%s5994_s1 + $0x4c] ss:$16 sps:$4 sm:$0xff]   ;;  %v4006_v10 = vld [vmem:[%s5994_s1 + $0x40] ss:$16 sps:$4 sm:$0xff]   ;;  %v4007_v11 = vld [vmem:[%s5994_s1 + $0x48] ss:$16 sps:$4 sm:$0xff]  }
   0x5   :  { %v4008_v12 = vld [vmem:[%s5994_s1 + $0x64] ss:$16 sps:$4 sm:$0xff]   ;;  %v4010_v13 = vld [vmem:[%s5994_s1 + $0x6c] ss:$16 sps:$4 sm:$0xff]   ;;  %v4012_v14 = vld [vmem:[%s5994_s1 + $0x60] ss:$16 sps:$4 sm:$0xff]  }
   0x6   :  { %v4013_v15 = vld [vmem:[%s5994_s1 + $0x68] ss:$16 sps:$4 sm:$0xff]   ;;  %v4014_v16 = vld [vmem:[%s5994_s1 + $0x84] ss:$16 sps:$4 sm:$0xff]   ;;  %v4016_v17 = vld [vmem:[%s5994_s1 + $0x8c] ss:$16 sps:$4 sm:$0xff]  }
   0x7   :  { %1636 = vmatpush1.bf16.msra.mxu0 %v4000_v6  ;;  %1808 = vmatpush1.bf16.msra.mxu1 %v4001_v7  ;;  %v4018_v18 = vld [vmem:[%s5994_s1 + $0x80] ss:$16 sps:$4 sm:$0xff]   ;;  %v4019_v19 = vld [vmem:[%s5994_s1 + $0x88] ss:$16 sps:$4 sm:$0xff]   ;;  %v4020_v20 = vld [vmem:[%s5994_s1 + $0xa4] ss:$16 sps:$4 sm:$0xff]  }
   0x8   :  { %1637 = vmatprep.subr.bf16.mxu0 %v4002_v8  ;;  %1809 = vmatprep.subr.bf16.mxu1 %v4004_v9  ;;  %v4022_v21 = vld [vmem:[%s5994_s1 + $0xac] ss:$16 sps:$4 sm:$0xff]   ;;  %v4024_v22 = vld [vmem:[%s5994_s1 + $0xa0] ss:$16 sps:$4 sm:$0xff]   ;;  %v4025_v23 = vld [vmem:[%s5994_s1 + $0xa8] ss:$16 sps:$4 sm:$0xff]  }
   0x9   :  { %v4026_v24 = vld [vmem:[%s5994_s1 + $0xc4] ss:$16 sps:$4 sm:$0xff]   ;;  %v4028_v25 = vld [vmem:[%s5994_s1 + $0xcc] ss:$16 sps:$4 sm:$0xff]   ;;  %v4030_v26 = vld [vmem:[%s5994_s1 + $0xc0] ss:$16 sps:$4 sm:$0xff]  }
   0xa   :  { %v4031_v27 = vld [vmem:[%s5994_s1 + $0xc8] ss:$16 sps:$4 sm:$0xff]   ;;  %v4032_v28 = vld [vmem:[%s5994_s1 + $0xe4] ss:$16 sps:$4 sm:$0xff]   ;;  %v4034_v29 = vld [vmem:[%s5994_s1 + $0xec] ss:$16 sps:$4 sm:$0xff]  }
   0xb   :  { %1638 = vmatpush1.bf16.msra.mxu0 %v4006_v10  ;;  %1810 = vmatpush1.bf16.msra.mxu1 %v4007_v11  ;;  %v4036_v30 = vld [vmem:[%s5994_s1 + $0xe0] ss:$16 sps:$4 sm:$0xff]   ;;  %v4037_v31 = vld [vmem:[%s5994_s1 + $0xe8] ss:$16 sps:$4 sm:$0xff]   ;;  %v4038_v32 = vld [vmem:[%s5994_s1 + $0x104] ss:$16 sps:$4 sm:$0xff]  }
   0xc   :  { %1639 = vmatprep.subr.bf16.mxu0 %v4008_v12  ;;  %1811 = vmatprep.subr.bf16.mxu1 %v4010_v13  ;;  %v4040_v33 = vld [vmem:[%s5994_s1 + $0x10c] ss:$16 sps:$4 sm:$0xff]   ;;  %v4042_v34 = vld [vmem:[%s5994_s1 + $0x100] ss:$16 sps:$4 sm:$0xff]   ;;  %v4043_v35 = vld [vmem:[%s5994_s1 + $0x108] ss:$16 sps:$4 sm:$0xff]  }
   0xd   :  { %v4044_v36 = vld [vmem:[%s5994_s1 + $0x124] ss:$16 sps:$4 sm:$0xff]   ;;  %v4046_v37 = vld [vmem:[%s5994_s1 + $0x12c] ss:$16 sps:$4 sm:$0xff]   ;;  %v4048_v38 = vld [vmem:[%s5994_s1 + $0x120] ss:$16 sps:$4 sm:$0xff]  }
   0xe   :  { %v4049_v39 = vld [vmem:[%s5994_s1 + $0x128] ss:$16 sps:$4 sm:$0xff]   ;;  %v4050_v40 = vld [vmem:[%s5994_s1 + $0x144] ss:$16 sps:$4 sm:$0xff]   ;;  %v4052_v41 = vld [vmem:[%s5994_s1 + $0x14c] ss:$16 sps:$4 sm:$0xff]  }
   0xf   :  { %1640 = vmatpush1.bf16.msra.mxu0 %v4012_v14  ;;  %1812 = vmatpush1.bf16.msra.mxu1 %v4013_v15  ;;  %v4054_v42 = vld [vmem:[%s5994_s1 + $0x140] ss:$16 sps:$4 sm:$0xff]   ;;  %v4055_v43 = vld [vmem:[%s5994_s1 + $0x148] ss:$16 sps:$4 sm:$0xff]   ;;  %v4056_v44 = vld [vmem:[%s5994_s1 + $0x164] ss:$16 sps:$4 sm:$0xff]  }
  0x10   :  { %1641 = vmatprep.subr.bf16.mxu0 %v4014_v16  ;;  %1813 = vmatprep.subr.bf16.mxu1 %v4016_v17  ;;  %v4058_v45 = vld [vmem:[%s5994_s1 + $0x16c] ss:$16 sps:$4 sm:$0xff]   ;;  %v27_v46 = vld [vmem:[%s5993_s0] sm:$0xff]  ;;  %v4061_v49 = vld [vmem:[%s5994_s1 + $0x168] ss:$16 sps:$4 sm:$0xff]  }
  0x11   :  { %v31_v47 = vld [vmem:[%s5993_s0 + $0x20] sm:$0xff]  ;;  %v4064_v52 = vld [vmem:[%s5994_s1 + $0x18c] ss:$16 sps:$4 sm:$0xff]   ;;  %v4067_v54 = vld [vmem:[%s5994_s1 + $0x188] ss:$16 sps:$4 sm:$0xff]  }
  0x12   :  { %v4060_v48 = vld [vmem:[%s5994_s1 + $0x160] ss:$16 sps:$4 sm:$0xff]   ;;  %v3492_v50 = vcombine.high %v27_v46, %v31_v47  ;;  %v4062_v51 = vld [vmem:[%s5994_s1 + $0x184] ss:$16 sps:$4 sm:$0xff]   ;;  %v4070_v56 = vld [vmem:[%s5994_s1 + $0x1ac] ss:$16 sps:$4 sm:$0xff]   ;;  %v3491_v5 = vcombine.low %v27_v46, %v31_v47 }
  0x13   :  { %1642 = vmatpush1.bf16.msra.mxu0 %v4018_v18  ;;  %1814 = vmatpush1.bf16.msra.mxu1 %v4019_v19  ;;  %v4066_v53 = vld [vmem:[%s5994_s1 + $0x180] ss:$16 sps:$4 sm:$0xff]   ;;  %v4068_v55 = vld [vmem:[%s5994_s1 + $0x1a4] ss:$16 sps:$4 sm:$0xff]   ;;  %v4073_v58 = vld [vmem:[%s5994_s1 + $0x1a8] ss:$16 sps:$4 sm:$0xff]  }
  0x14   :  { %1643 = vmatprep.subr.bf16.mxu0 %v4020_v20  ;;  %1815 = vmatprep.subr.bf16.mxu1 %v4022_v21  ;;  %v4072_v57 = vld [vmem:[%s5994_s1 + $0x1a0] ss:$16 sps:$4 sm:$0xff]   ;;  %v4074_v59 = vld [vmem:[%s5994_s1 + $0x1c4] ss:$16 sps:$4 sm:$0xff]   ;;  %v4076_v60 = vld [vmem:[%s5994_s1 + $0x1cc] ss:$16 sps:$4 sm:$0xff]  }
  0x15   :  { %1665 = vmatprep.mubr.bf16.mxu0 %v3492_v50  ;;  %1837 = vmatprep.mubr.bf16.mxu1 %v3492_v50  ;;  %v4078_v61 = vld [vmem:[%s5994_s1 + $0x1c0] ss:$16 sps:$4 sm:$0xff]   ;;  %v4079_v62 = vld [vmem:[%s5994_s1 + $0x1c8] ss:$16 sps:$4 sm:$0xff]   ;;  %v4080_v63 = vld [vmem:[%s5994_s1 + $0x1e4] ss:$16 sps:$4 sm:$0xff]  }
  0x16   :  { %v4082_v0 = vld [vmem:[%s5994_s1 + $0x1ec] ss:$16 sps:$4 sm:$0xff]   ;;  %v4084_v1 = vld [vmem:[%s5994_s1 + $0x1e0] ss:$16 sps:$4 sm:$0xff]   ;;  %v4085_v2 = vld [vmem:[%s5994_s1 + $0x1e8] ss:$16 sps:$4 sm:$0xff]  }
  0x17   :  { %1644 = vmatpush1.bf16.msra.mxu0 %v4024_v22  ;;  %1816 = vmatpush1.bf16.msra.mxu1 %v4025_v23  ;;  %v4088_v3 = vld [vmem:[%s5994_s1 + $0x204] ss:$16 sps:$4 sm:$0xff]   ;;  %v4091_v4 = vld [vmem:[%s5994_s1 + $0x20c] ss:$16 sps:$4 sm:$0xff]   ;;  %v4086_v6 = vld [vmem:[%s5994_s1 + $0x200] ss:$16 sps:$4 sm:$0xff]  }
  0x18   :  { %1645 = vmatprep.subr.bf16.mxu0 %v4026_v24  ;;  %1817 = vmatprep.subr.bf16.mxu1 %v4028_v25  ;;  %v4089_v7 = vld [vmem:[%s5994_s1 + $0x208] ss:$16 sps:$4 sm:$0xff]   ;;  %v4094_v8 = vld [vmem:[%s5994_s1 + $0x224] ss:$16 sps:$4 sm:$0xff]   ;;  %v4097_v9 = vld [vmem:[%s5994_s1 + $0x22c] ss:$16 sps:$4 sm:$0xff]  }
  0x19   :  { %v4092_v10 = vld [vmem:[%s5994_s1 + $0x220] ss:$16 sps:$4 sm:$0xff]   ;;  %v4095_v11 = vld [vmem:[%s5994_s1 + $0x228] ss:$16 sps:$4 sm:$0xff]   ;;  %v4100_v12 = vld [vmem:[%s5994_s1 + $0x244] ss:$16 sps:$4 sm:$0xff]  }
  0x1a   :  { %v4103_v13 = vld [vmem:[%s5994_s1 + $0x24c] ss:$16 sps:$4 sm:$0xff]   ;;  %v4098_v14 = vld [vmem:[%s5994_s1 + $0x240] ss:$16 sps:$4 sm:$0xff]   ;;  %v4101_v15 = vld [vmem:[%s5994_s1 + $0x248] ss:$16 sps:$4 sm:$0xff]  }
  0x1b   :  { %1646 = vmatpush1.bf16.msra.mxu0 %v4030_v26  ;;  %1818 = vmatpush1.bf16.msra.mxu1 %v4031_v27  ;;  %v4106_v16 = vld [vmem:[%s5994_s1 + $0x264] ss:$16 sps:$4 sm:$0xff]   ;;  %v4109_v17 = vld [vmem:[%s5994_s1 + $0x26c] ss:$16 sps:$4 sm:$0xff]   ;;  %v4104_v18 = vld [vmem:[%s5994_s1 + $0x260] ss:$16 sps:$4 sm:$0xff]  }
  0x1c   :  { %1647 = vmatprep.subr.bf16.mxu0 %v4032_v28  ;;  %1819 = vmatprep.subr.bf16.mxu1 %v4034_v29  ;;  %v4107_v19 = vld [vmem:[%s5994_s1 + $0x268] ss:$16 sps:$4 sm:$0xff]   ;;  %v4112_v20 = vld [vmem:[%s5994_s1 + $0x284] ss:$16 sps:$4 sm:$0xff]   ;;  %v4115_v21 = vld [vmem:[%s5994_s1 + $0x28c] ss:$16 sps:$4 sm:$0xff]  }
  0x1d   :  { %v4110_v22 = vld [vmem:[%s5994_s1 + $0x280] ss:$16 sps:$4 sm:$0xff]   ;;  %v4113_v23 = vld [vmem:[%s5994_s1 + $0x288] ss:$16 sps:$4 sm:$0xff]   ;;  %v4118_v24 = vld [vmem:[%s5994_s1 + $0x2a4] ss:$16 sps:$4 sm:$0xff]  }
  0x1e   :  { %v4121_v25 = vld [vmem:[%s5994_s1 + $0x2ac] ss:$16 sps:$4 sm:$0xff]   ;;  %v4116_v26 = vld [vmem:[%s5994_s1 + $0x2a0] ss:$16 sps:$4 sm:$0xff]   ;;  %v4119_v27 = vld [vmem:[%s5994_s1 + $0x2a8] ss:$16 sps:$4 sm:$0xff]  }
  0x1f   :  { %1648 = vmatpush1.bf16.msra.mxu0 %v4036_v30  ;;  %1820 = vmatpush1.bf16.msra.mxu1 %v4037_v31  ;;  %v4124_v28 = vld [vmem:[%s5994_s1 + $0x2c4] ss:$16 sps:$4 sm:$0xff]   ;;  %v4127_v29 = vld [vmem:[%s5994_s1 + $0x2cc] ss:$16 sps:$4 sm:$0xff]   ;;  %v4143_v46 = vld [vmem:[%s5994_s1 + $0x328] ss:$16 sps:$4 sm:$0xff]  }
  0x20   :  { %1649 = vmatprep.subr.bf16.mxu0 %v4038_v32  ;;  %1821 = vmatprep.subr.bf16.mxu1 %v4040_v33  ;;  %v4816_v30 = vld [vmem:[%s5993_s0 + $0x8] sm:$0xff]  ;;  %v4122_v32 = vld [vmem:[%s5994_s1 + $0x2c0] ss:$16 sps:$4 sm:$0xff]   ;;  %v4148_v47 = vld [vmem:[%s5994_s1 + $0x344] ss:$16 sps:$4 sm:$0xff]  }
  0x21   :  { %v4821_v31 = vld [vmem:[%s5993_s0 + $0x28] sm:$0xff] }
  0x22   :  { %v4125_v33 = vld [vmem:[%s5994_s1 + $0x2c8] ss:$16 sps:$4 sm:$0xff]  }
  0x23   :  { %1650 = vmatpush1.bf16.msra.mxu0 %v4042_v34  ;;  %1822 = vmatpush1.bf16.msra.mxu1 %v4043_v35  ;;  %v3494_v34 = vcombine.high %v4816_v30, %v4821_v31  ;;  %v4130_v35 = vld [vmem:[%s5994_s1 + $0x2e4] ss:$16 sps:$4 sm:$0xff]   ;;  %v4149_v50 = vld [vmem:[%s5994_s1 + $0x348] ss:$16 sps:$4 sm:$0xff]  }
  0x24   :  { %1651 = vmatprep.subr.bf16.mxu0 %v4044_v36  ;;  %1823 = vmatprep.subr.bf16.mxu1 %v4046_v37  ;;  %v4133_v36 = vld [vmem:[%s5994_s1 + $0x2ec] ss:$16 sps:$4 sm:$0xff]   ;;  %v4128_v37 = vld [vmem:[%s5994_s1 + $0x2e0] ss:$16 sps:$4 sm:$0xff]  }
  0x27   :  { %1652 = vmatpush1.bf16.msra.mxu0 %v4048_v38  ;;  %1824 = vmatpush1.bf16.msra.mxu1 %v4049_v39  ;;  %v4131_v38 = vld [vmem:[%s5994_s1 + $0x2e8] ss:$16 sps:$4 sm:$0xff]   ;;  %v4136_v39 = vld [vmem:[%s5994_s1 + $0x304] ss:$16 sps:$4 sm:$0xff]  }
  0x28   :  { %1653 = vmatprep.subr.bf16.mxu0 %v4050_v40  ;;  %1825 = vmatprep.subr.bf16.mxu1 %v4052_v41  ;;  %v4139_v40 = vld [vmem:[%s5994_s1 + $0x30c] ss:$16 sps:$4 sm:$0xff]   ;;  %v4134_v41 = vld [vmem:[%s5994_s1 + $0x300] ss:$16 sps:$4 sm:$0xff]  }
  0x2b   :  { %1654 = vmatpush1.bf16.msra.mxu0 %v4054_v42  ;;  %1826 = vmatpush1.bf16.msra.mxu1 %v4055_v43  ;;  %v4137_v42 = vld [vmem:[%s5994_s1 + $0x308] ss:$16 sps:$4 sm:$0xff]   ;;  %v4142_v43 = vld [vmem:[%s5994_s1 + $0x324] ss:$16 sps:$4 sm:$0xff]  }
  0x2c   :  { %1655 = vmatprep.subr.bf16.mxu0 %v4056_v44  ;;  %1827 = vmatprep.subr.bf16.mxu1 %v4058_v45  ;;  %v4145_v44 = vld [vmem:[%s5994_s1 + $0x32c] ss:$16 sps:$4 sm:$0xff]   ;;  %v4140_v45 = vld [vmem:[%s5994_s1 + $0x320] ss:$16 sps:$4 sm:$0xff]  }
  0x2f   :  { %1656 = vmatpush1.bf16.msra.mxu0 %v4060_v48  ;;  %1828 = vmatpush1.bf16.msra.mxu1 %v4061_v49  ;;  %v4151_v48 = vld [vmem:[%s5994_s1 + $0x34c] ss:$16 sps:$4 sm:$0xff]   ;;  %v4146_v49 = vld [vmem:[%s5994_s1 + $0x340] ss:$16 sps:$4 sm:$0xff]  }
  0x30   :  { %1657 = vmatprep.subr.bf16.mxu0 %v4062_v51  ;;  %1829 = vmatprep.subr.bf16.mxu1 %v4064_v52  ;;  %v4154_v51 = vld [vmem:[%s5994_s1 + $0x364] ss:$16 sps:$4 sm:$0xff]   ;;  %v4157_v52 = vld [vmem:[%s5994_s1 + $0x36c] ss:$16 sps:$4 sm:$0xff]  }
  0x33   :  { %1658 = vmatpush1.bf16.msra.mxu0 %v4066_v53  ;;  %1830 = vmatpush1.bf16.msra.mxu1 %v4067_v54  ;;  %v4152_v53 = vld [vmem:[%s5994_s1 + $0x360] ss:$16 sps:$4 sm:$0xff]   ;;  %v4155_v54 = vld [vmem:[%s5994_s1 + $0x368] ss:$16 sps:$4 sm:$0xff]  }
  0x34   :  { %1659 = vmatprep.subr.bf16.mxu0 %v4068_v55  ;;  %1831 = vmatprep.subr.bf16.mxu1 %v4070_v56  ;;  %v4160_v55 = vld [vmem:[%s5994_s1 + $0x384] ss:$16 sps:$4 sm:$0xff]   ;;  %v4163_v56 = vld [vmem:[%s5994_s1 + $0x38c] ss:$16 sps:$4 sm:$0xff]  }
  0x37   :  { %1660 = vmatpush1.bf16.msra.mxu0 %v4072_v57  ;;  %1832 = vmatpush1.bf16.msra.mxu1 %v4073_v58  ;;  %v4158_v57 = vld [vmem:[%s5994_s1 + $0x380] ss:$16 sps:$4 sm:$0xff]   ;;  %v4161_v58 = vld [vmem:[%s5994_s1 + $0x388] ss:$16 sps:$4 sm:$0xff]  }
  0x38   :  { %1661 = vmatprep.subr.bf16.mxu0 %v4074_v59  ;;  %1833 = vmatprep.subr.bf16.mxu1 %v4076_v60  ;;  %v4166_v59 = vld [vmem:[%s5994_s1 + $0x3a4] ss:$16 sps:$4 sm:$0xff]   ;;  %v4169_v60 = vld [vmem:[%s5994_s1 + $0x3ac] ss:$16 sps:$4 sm:$0xff]  }
  0x3b   :  { %1662 = vmatpush1.bf16.msra.mxu0 %v4078_v61  ;;  %1834 = vmatpush1.bf16.msra.mxu1 %v4079_v62  ;;  %v4164_v61 = vld [vmem:[%s5994_s1 + $0x3a0] ss:$16 sps:$4 sm:$0xff]   ;;  %v4167_v62 = vld [vmem:[%s5994_s1 + $0x3a8] ss:$16 sps:$4 sm:$0xff]  }
  0x3c   :  { %1663 = vmatprep.subr.bf16.mxu0 %v4080_v63  ;;  %1835 = vmatprep.subr.bf16.mxu1 %v4082_v0  ;;  %v4172_v63 = vld [vmem:[%s5994_s1 + $0x3c4] ss:$16 sps:$4 sm:$0xff]   ;;  %v4175_v0 = vld [vmem:[%s5994_s1 + $0x3cc] ss:$16 sps:$4 sm:$0xff]  }
  0x3f   :  { %1664 = vmatpush1.bf16.msra.mxu0 %v4084_v1  ;;  %1836 = vmatpush1.bf16.msra.mxu1 %v4085_v2  ;;  %v4170_v1 = vld [vmem:[%s5994_s1 + $0x3c0] ss:$16 sps:$4 sm:$0xff]   ;;  %v4173_v2 = vld [vmem:[%s5994_s1 + $0x3c8] ss:$16 sps:$4 sm:$0xff]  }
  0x40   :  { %1676 = vmatprep.subr.bf16.mxu0 %v4088_v3  ;;  %1848 = vmatprep.subr.bf16.mxu1 %v4091_v4  ;;  %v4178_v3 = vld [vmem:[%s5994_s1 + $0x3e4] ss:$16 sps:$4 sm:$0xff]   ;;  %v4181_v4 = vld [vmem:[%s5994_s1 + $0x3ec] ss:$16 sps:$4 sm:$0xff]  }
  0x42   :  { %1666 = vmatmul.mubr.bf16.vlgmr.msra.gmra.mrb[0].mxu0 %v3491_v5  ;;  %1838 = vmatmul.mubr.bf16.vlgmr.msra.gmra.mrb[0].mxu1 %v3491_v5  ;;  %v4176_v5 = vld [vmem:[%s5994_s1 + $0x3e0] ss:$16 sps:$4 sm:$0xff]  }
  0x43   :  { %1677 = vmatpush1.bf16.msra.mxu0 %v4086_v6  ;;  %1849 = vmatpush1.bf16.msra.mxu1 %v4089_v7  ;;  %v4179_v6 = vld [vmem:[%s5994_s1 + $0x3e8] ss:$16 sps:$4 sm:$0xff]   ;;  %v4184_v7 = vld [vmem:[%s5994_s1 + $0x404] ss:$16 sps:$4 sm:$0xff]  }
  0x44   :  { %1678 = vmatprep.subr.bf16.mxu0 %v4094_v8  ;;  %1850 = vmatprep.subr.bf16.mxu1 %v4097_v9  ;;  %v4187_v8 = vld [vmem:[%s5994_s1 + $0x40c] ss:$16 sps:$4 sm:$0xff]   ;;  %v3493_v9 = vcombine.low %v4816_v30, %v4821_v31  ;;  %v4209_v30 = vld [vmem:[%s5994_s1 + $0x488] ss:$16 sps:$4 sm:$0xff]   ;;  %v4214_v31 = vld [vmem:[%s5994_s1 + $0x4a4] ss:$16 sps:$4 sm:$0xff]  }
  0x45   :  { %1708 = vmatprep.mubr.bf16.mxu0 %v3494_v34  ;;  %1880 = vmatprep.mubr.bf16.mxu1 %v3494_v34  ;;  %v4215_v34 = vld [vmem:[%s5994_s1 + $0x4a8] ss:$16 sps:$4 sm:$0xff]  }
  0x47   :  { %1679 = vmatpush1.bf16.msra.mxu0 %v4092_v10  ;;  %1851 = vmatpush1.bf16.msra.mxu1 %v4095_v11  ;;  %v4182_v10 = vld [vmem:[%s5994_s1 + $0x400] ss:$16 sps:$4 sm:$0xff]   ;;  %v4185_v11 = vld [vmem:[%s5994_s1 + $0x408] ss:$16 sps:$4 sm:$0xff]  }
  0x48   :  { %1680 = vmatprep.subr.bf16.mxu0 %v4100_v12  ;;  %1852 = vmatprep.subr.bf16.mxu1 %v4103_v13  ;;  %v4190_v12 = vld [vmem:[%s5994_s1 + $0x424] ss:$16 sps:$4 sm:$0xff]   ;;  %v4193_v13 = vld [vmem:[%s5994_s1 + $0x42c] ss:$16 sps:$4 sm:$0xff]  }
  0x4b   :  { %1681 = vmatpush1.bf16.msra.mxu0 %v4098_v14  ;;  %1853 = vmatpush1.bf16.msra.mxu1 %v4101_v15  ;;  %v4962_v14 = vld [vmem:[%s5993_s0 + $0x10] sm:$0xff] }
  0x4c   :  { %1682 = vmatprep.subr.bf16.mxu0 %v4106_v16  ;;  %1854 = vmatprep.subr.bf16.mxu1 %v4109_v17  ;;  %v4967_v15 = vld [vmem:[%s5993_s0 + $0x30] sm:$0xff] }
  0x4d   :  { %v3496_v16 = vcombine.high %v4962_v14, %v4967_v15  ;;  %v4188_v17 = vld [vmem:[%s5994_s1 + $0x420] ss:$16 sps:$4 sm:$0xff]  }
  0x4f   :  { %1683 = vmatpush1.bf16.msra.mxu0 %v4104_v18  ;;  %1855 = vmatpush1.bf16.msra.mxu1 %v4107_v19  ;;  %v4191_v18 = vld [vmem:[%s5994_s1 + $0x428] ss:$16 sps:$4 sm:$0xff]   ;;  %v4196_v19 = vld [vmem:[%s5994_s1 + $0x444] ss:$16 sps:$4 sm:$0xff]  }
  0x50   :  { %1684 = vmatprep.subr.bf16.mxu0 %v4112_v20  ;;  %1856 = vmatprep.subr.bf16.mxu1 %v4115_v21  ;;  %v4199_v20 = vld [vmem:[%s5994_s1 + $0x44c] ss:$16 sps:$4 sm:$0xff]   ;;  %v4194_v21 = vld [vmem:[%s5994_s1 + $0x440] ss:$16 sps:$4 sm:$0xff]  }
  0x53   :  { %1685 = vmatpush1.bf16.msra.mxu0 %v4110_v22  ;;  %1857 = vmatpush1.bf16.msra.mxu1 %v4113_v23  ;;  %v4197_v22 = vld [vmem:[%s5994_s1 + $0x448] ss:$16 sps:$4 sm:$0xff]   ;;  %v4202_v23 = vld [vmem:[%s5994_s1 + $0x464] ss:$16 sps:$4 sm:$0xff]  }
  0x54   :  { %1686 = vmatprep.subr.bf16.mxu0 %v4118_v24  ;;  %1858 = vmatprep.subr.bf16.mxu1 %v4121_v25  ;;  %v4205_v24 = vld [vmem:[%s5994_s1 + $0x46c] ss:$16 sps:$4 sm:$0xff]   ;;  %v4200_v25 = vld [vmem:[%s5994_s1 + $0x460] ss:$16 sps:$4 sm:$0xff]  }
  0x57   :  { %1687 = vmatpush1.bf16.msra.mxu0 %v4116_v26  ;;  %1859 = vmatpush1.bf16.msra.mxu1 %v4119_v27  ;;  %v4203_v26 = vld [vmem:[%s5994_s1 + $0x468] ss:$16 sps:$4 sm:$0xff]   ;;  %v4208_v27 = vld [vmem:[%s5994_s1 + $0x484] ss:$16 sps:$4 sm:$0xff]  }
  0x58   :  { %1688 = vmatprep.subr.bf16.mxu0 %v4124_v28  ;;  %1860 = vmatprep.subr.bf16.mxu1 %v4127_v29  ;;  %v4211_v28 = vld [vmem:[%s5994_s1 + $0x48c] ss:$16 sps:$4 sm:$0xff]   ;;  %v4206_v29 = vld [vmem:[%s5994_s1 + $0x480] ss:$16 sps:$4 sm:$0xff]  }
  0x5b   :  { %1689 = vmatpush1.bf16.msra.mxu0 %v4122_v32  ;;  %1861 = vmatpush1.bf16.msra.mxu1 %v4125_v33  ;;  %v4217_v32 = vld [vmem:[%s5994_s1 + $0x4ac] ss:$16 sps:$4 sm:$0xff]   ;;  %v4212_v33 = vld [vmem:[%s5994_s1 + $0x4a0] ss:$16 sps:$4 sm:$0xff]  }
  0x5c   :  { %1690 = vmatprep.subr.bf16.mxu0 %v4130_v35  ;;  %1862 = vmatprep.subr.bf16.mxu1 %v4133_v36  ;;  %v4220_v35 = vld [vmem:[%s5994_s1 + $0x4c4] ss:$16 sps:$4 sm:$0xff]   ;;  %v4223_v36 = vld [vmem:[%s5994_s1 + $0x4cc] ss:$16 sps:$4 sm:$0xff]  }
  0x5f   :  { %1691 = vmatpush1.bf16.msra.mxu0 %v4128_v37  ;;  %1863 = vmatpush1.bf16.msra.mxu1 %v4131_v38  ;;  %v4218_v37 = vld [vmem:[%s5994_s1 + $0x4c0] ss:$16 sps:$4 sm:$0xff]   ;;  %v4221_v38 = vld [vmem:[%s5994_s1 + $0x4c8] ss:$16 sps:$4 sm:$0xff]  }
  0x60   :  { %1692 = vmatprep.subr.bf16.mxu0 %v4136_v39  ;;  %1864 = vmatprep.subr.bf16.mxu1 %v4139_v40  ;;  %v4226_v39 = vld [vmem:[%s5994_s1 + $0x4e4] ss:$16 sps:$4 sm:$0xff]   ;;  %v4229_v40 = vld [vmem:[%s5994_s1 + $0x4ec] ss:$16 sps:$4 sm:$0xff]  }
  0x63   :  { %1693 = vmatpush1.bf16.msra.mxu0 %v4134_v41  ;;  %1865 = vmatpush1.bf16.msra.mxu1 %v4137_v42  ;;  %v4224_v41 = vld [vmem:[%s5994_s1 + $0x4e0] ss:$16 sps:$4 sm:$0xff]   ;;  %v4227_v42 = vld [vmem:[%s5994_s1 + $0x4e8] ss:$16 sps:$4 sm:$0xff]  }
  0x64   :  { %1694 = vmatprep.subr.bf16.mxu0 %v4142_v43  ;;  %1866 = vmatprep.subr.bf16.mxu1 %v4145_v44  ;;  %v4232_v43 = vld [vmem:[%s5994_s1 + $0x504] ss:$16 sps:$4 sm:$0xff]   ;;  %v4235_v44 = vld [vmem:[%s5994_s1 + $0x50c] ss:$16 sps:$4 sm:$0xff]  }
  0x67   :  { %1695 = vmatpush1.bf16.msra.mxu0 %v4140_v45  ;;  %1867 = vmatpush1.bf16.msra.mxu1 %v4143_v46  ;;  %v4230_v45 = vld [vmem:[%s5994_s1 + $0x500] ss:$16 sps:$4 sm:$0xff]   ;;  %v4233_v46 = vld [vmem:[%s5994_s1 + $0x508] ss:$16 sps:$4 sm:$0xff]  }
  0x68   :  { %1696 = vmatprep.subr.bf16.mxu0 %v4148_v47  ;;  %1868 = vmatprep.subr.bf16.mxu1 %v4151_v48  ;;  %v4238_v47 = vld [vmem:[%s5994_s1 + $0x524] ss:$16 sps:$4 sm:$0xff]   ;;  %v4241_v48 = vld [vmem:[%s5994_s1 + $0x52c] ss:$16 sps:$4 sm:$0xff]  }
  0x6b   :  { %1697 = vmatpush1.bf16.msra.mxu0 %v4146_v49  ;;  %1869 = vmatpush1.bf16.msra.mxu1 %v4149_v50  ;;  %v4236_v49 = vld [vmem:[%s5994_s1 + $0x520] ss:$16 sps:$4 sm:$0xff]   ;;  %v4239_v50 = vld [vmem:[%s5994_s1 + $0x528] ss:$16 sps:$4 sm:$0xff]  }
  0x6c   :  { %1698 = vmatprep.subr.bf16.mxu0 %v4154_v51  ;;  %1870 = vmatprep.subr.bf16.mxu1 %v4157_v52  ;;  %v4244_v51 = vld [vmem:[%s5994_s1 + $0x544] ss:$16 sps:$4 sm:$0xff]   ;;  %v4247_v52 = vld [vmem:[%s5994_s1 + $0x54c] ss:$16 sps:$4 sm:$0xff]  }
  0x6f   :  { %1699 = vmatpush1.bf16.msra.mxu0 %v4152_v53  ;;  %1871 = vmatpush1.bf16.msra.mxu1 %v4155_v54  ;;  %v4242_v53 = vld [vmem:[%s5994_s1 + $0x540] ss:$16 sps:$4 sm:$0xff]   ;;  %v4245_v54 = vld [vmem:[%s5994_s1 + $0x548] ss:$16 sps:$4 sm:$0xff]  }
  0x70   :  { %1700 = vmatprep.subr.bf16.mxu0 %v4160_v55  ;;  %1872 = vmatprep.subr.bf16.mxu1 %v4163_v56  ;;  %v4250_v55 = vld [vmem:[%s5994_s1 + $0x564] ss:$16 sps:$4 sm:$0xff]   ;;  %v4253_v56 = vld [vmem:[%s5994_s1 + $0x56c] ss:$16 sps:$4 sm:$0xff]  }
  0x73   :  { %1701 = vmatpush1.bf16.msra.mxu0 %v4158_v57  ;;  %1873 = vmatpush1.bf16.msra.mxu1 %v4161_v58  ;;  %v4248_v57 = vld [vmem:[%s5994_s1 + $0x560] ss:$16 sps:$4 sm:$0xff]   ;;  %v4251_v58 = vld [vmem:[%s5994_s1 + $0x568] ss:$16 sps:$4 sm:$0xff]  }
  0x74   :  { %1702 = vmatprep.subr.bf16.mxu0 %v4166_v59  ;;  %1874 = vmatprep.subr.bf16.mxu1 %v4169_v60  ;;  %v4256_v59 = vld [vmem:[%s5994_s1 + $0x584] ss:$16 sps:$4 sm:$0xff]   ;;  %v4259_v60 = vld [vmem:[%s5994_s1 + $0x58c] ss:$16 sps:$4 sm:$0xff]  }
  0x77   :  { %1703 = vmatpush1.bf16.msra.mxu0 %v4164_v61  ;;  %1875 = vmatpush1.bf16.msra.mxu1 %v4167_v62  ;;  %v4254_v61 = vld [vmem:[%s5994_s1 + $0x580] ss:$16 sps:$4 sm:$0xff]   ;;  %v4257_v62 = vld [vmem:[%s5994_s1 + $0x588] ss:$16 sps:$4 sm:$0xff]  }
  0x78   :  { %1704 = vmatprep.subr.bf16.mxu0 %v4172_v63  ;;  %1876 = vmatprep.subr.bf16.mxu1 %v4175_v0  ;;  %v4262_v63 = vld [vmem:[%s5994_s1 + $0x5a4] ss:$16 sps:$4 sm:$0xff]   ;;  %v4265_v0 = vld [vmem:[%s5994_s1 + $0x5ac] ss:$16 sps:$4 sm:$0xff]  }
  0x7b   :  { %1705 = vmatpush1.bf16.msra.mxu0 %v4170_v1  ;;  %1877 = vmatpush1.bf16.msra.mxu1 %v4173_v2  ;;  %v4260_v1 = vld [vmem:[%s5994_s1 + $0x5a0] ss:$16 sps:$4 sm:$0xff]   ;;  %v4263_v2 = vld [vmem:[%s5994_s1 + $0x5a8] ss:$16 sps:$4 sm:$0xff]  }
  0x7c   :  { %1706 = vmatprep.subr.bf16.mxu0 %v4178_v3  ;;  %1878 = vmatprep.subr.bf16.mxu1 %v4181_v4  ;;  %v4268_v3 = vld [vmem:[%s5994_s1 + $0x5c4] ss:$16 sps:$4 sm:$0xff]   ;;  %v4271_v4 = vld [vmem:[%s5994_s1 + $0x5cc] ss:$16 sps:$4 sm:$0xff]  }
  0x7f   :  { %1707 = vmatpush1.bf16.msra.mxu0 %v4176_v5  ;;  %1879 = vmatpush1.bf16.msra.mxu1 %v4179_v6  ;;  %v4266_v5 = vld [vmem:[%s5994_s1 + $0x5c0] ss:$16 sps:$4 sm:$0xff]   ;;  %v4269_v6 = vld [vmem:[%s5994_s1 + $0x5c8] ss:$16 sps:$4 sm:$0xff]  }
  0x80   :  { %1719 = vmatprep.subr.bf16.mxu0 %v4184_v7  ;;  %1891 = vmatprep.subr.bf16.mxu1 %v4187_v8  ;;  %v4274_v7 = vld [vmem:[%s5994_s1 + $0x5e4] ss:$16 sps:$4 sm:$0xff]   ;;  %v4277_v8 = vld [vmem:[%s5994_s1 + $0x5ec] ss:$16 sps:$4 sm:$0xff]  }
  0x82   :  { %1709 = vmatmul.mubr.bf16.vlgmr.msra.gmra.mrb[0].mxu0 %v3493_v9  ;;  %1881 = vmatmul.mubr.bf16.vlgmr.msra.gmra.mrb[0].mxu1 %v3493_v9  ;;  %v4272_v9 = vld [vmem:[%s5994_s1 + $0x5e0] ss:$16 sps:$4 sm:$0xff]  }
  0x83   :  { %1720 = vmatpush1.bf16.msra.mxu0 %v4182_v10  ;;  %1892 = vmatpush1.bf16.msra.mxu1 %v4185_v11  ;;  %v4275_v10 = vld [vmem:[%s5994_s1 + $0x5e8] ss:$16 sps:$4 sm:$0xff]   ;;  %v4280_v11 = vld [vmem:[%s5994_s1 + $0x604] ss:$16 sps:$4 sm:$0xff]  }
  0x84   :  { %1721 = vmatprep.subr.bf16.mxu0 %v4190_v12  ;;  %1893 = vmatprep.subr.bf16.mxu1 %v4193_v13  ;;  %v4283_v12 = vld [vmem:[%s5994_s1 + $0x60c] ss:$16 sps:$4 sm:$0xff]   ;;  %v4278_v13 = vld [vmem:[%s5994_s1 + $0x600] ss:$16 sps:$4 sm:$0xff]  }
  0x85   :  { %1751 = vmatprep.mubr.bf16.mxu0 %v3496_v16  ;;  %1923 = vmatprep.mubr.bf16.mxu1 %v3496_v16  ;;  %v4281_v16 = vld [vmem:[%s5994_s1 + $0x608] ss:$16 sps:$4 sm:$0xff]  }
  0x87   :  { %1722 = vmatpush1.bf16.msra.mxu0 %v4188_v17  ;;  %1894 = vmatpush1.bf16.msra.mxu1 %v4191_v18  ;;  %v3495_v17 = vcombine.low %v4962_v14, %v4967_v15  ;;  %v4286_v18 = vld [vmem:[%s5994_s1 + $0x624] ss:$16 sps:$4 sm:$0xff]   ;;  %v4289_v14 = vld [vmem:[%s5994_s1 + $0x62c] ss:$16 sps:$4 sm:$0xff]   ;;  %v4284_v15 = vld [vmem:[%s5994_s1 + $0x620] ss:$16 sps:$4 sm:$0xff]  }
  0x88   :  { %1723 = vmatprep.subr.bf16.mxu0 %v4196_v19  ;;  %1895 = vmatprep.subr.bf16.mxu1 %v4199_v20  ;;  %v5165_v19 = vld [vmem:[%s5993_s0 + $0x18] sm:$0xff] }
  0x89   :  { %v5170_v20 = vld [vmem:[%s5993_s0 + $0x38] sm:$0xff] }
  0x8b   :  { %1724 = vmatpush1.bf16.msra.mxu0 %v4194_v21  ;;  %1896 = vmatpush1.bf16.msra.mxu1 %v4197_v22  ;;  %v4287_v21 = vld [vmem:[%s5994_s1 + $0x628] ss:$16 sps:$4 sm:$0xff]   ;;  %v3498_v22 = vcombine.high %v5165_v19, %v5170_v20 }
  0x8c   :  { %1725 = vmatprep.subr.bf16.mxu0 %v4202_v23  ;;  %1897 = vmatprep.subr.bf16.mxu1 %v4205_v24  ;;  %v4292_v23 = vld [vmem:[%s5994_s1 + $0x644] ss:$16 sps:$4 sm:$0xff]   ;;  %v4295_v24 = vld [vmem:[%s5994_s1 + $0x64c] ss:$16 sps:$4 sm:$0xff]  }
  0x8f   :  { %1726 = vmatpush1.bf16.msra.mxu0 %v4200_v25  ;;  %1898 = vmatpush1.bf16.msra.mxu1 %v4203_v26  ;;  %v4290_v25 = vld [vmem:[%s5994_s1 + $0x640] ss:$16 sps:$4 sm:$0xff]   ;;  %v4293_v26 = vld [vmem:[%s5994_s1 + $0x648] ss:$16 sps:$4 sm:$0xff]  }
  0x90   :  { %1727 = vmatprep.subr.bf16.mxu0 %v4208_v27  ;;  %1899 = vmatprep.subr.bf16.mxu1 %v4211_v28  ;;  %v4298_v27 = vld [vmem:[%s5994_s1 + $0x664] ss:$16 sps:$4 sm:$0xff]   ;;  %v4301_v28 = vld [vmem:[%s5994_s1 + $0x66c] ss:$16 sps:$4 sm:$0xff]  }
  0x93   :  { %1728 = vmatpush1.bf16.msra.mxu0 %v4206_v29  ;;  %1900 = vmatpush1.bf16.msra.mxu1 %v4209_v30  ;;  %v4296_v29 = vld [vmem:[%s5994_s1 + $0x660] ss:$16 sps:$4 sm:$0xff]   ;;  %v4299_v30 = vld [vmem:[%s5994_s1 + $0x668] ss:$16 sps:$4 sm:$0xff]  }
  0x94   :  { %1729 = vmatprep.subr.bf16.mxu0 %v4214_v31  ;;  %1901 = vmatprep.subr.bf16.mxu1 %v4217_v32 }
  0x97   :  { %1730 = vmatpush1.bf16.msra.mxu0 %v4212_v33  ;;  %1902 = vmatpush1.bf16.msra.mxu1 %v4215_v34 }
  0x98   :  { %1731 = vmatprep.subr.bf16.mxu0 %v4220_v35  ;;  %1903 = vmatprep.subr.bf16.mxu1 %v4223_v36 }
  0x9b   :  { %1732 = vmatpush1.bf16.msra.mxu0 %v4218_v37  ;;  %1904 = vmatpush1.bf16.msra.mxu1 %v4221_v38 }
  0x9c   :  { %1733 = vmatprep.subr.bf16.mxu0 %v4226_v39  ;;  %1905 = vmatprep.subr.bf16.mxu1 %v4229_v40 }
  0x9f   :  { %1734 = vmatpush1.bf16.msra.mxu0 %v4224_v41  ;;  %1906 = vmatpush1.bf16.msra.mxu1 %v4227_v42 }
  0xa0   :  { %1735 = vmatprep.subr.bf16.mxu0 %v4232_v43  ;;  %1907 = vmatprep.subr.bf16.mxu1 %v4235_v44 }
  0xa3   :  { %1736 = vmatpush1.bf16.msra.mxu0 %v4230_v45  ;;  %1908 = vmatpush1.bf16.msra.mxu1 %v4233_v46 }
  0xa4   :  { %1737 = vmatprep.subr.bf16.mxu0 %v4238_v47  ;;  %1909 = vmatprep.subr.bf16.mxu1 %v4241_v48 }
  0xa7   :  { %1738 = vmatpush1.bf16.msra.mxu0 %v4236_v49  ;;  %1910 = vmatpush1.bf16.msra.mxu1 %v4239_v50 }
  0xa8   :  { %1739 = vmatprep.subr.bf16.mxu0 %v4244_v51  ;;  %1911 = vmatprep.subr.bf16.mxu1 %v4247_v52 }
  0xab   :  { %1740 = vmatpush1.bf16.msra.mxu0 %v4242_v53  ;;  %1912 = vmatpush1.bf16.msra.mxu1 %v4245_v54 }
  0xac   :  { %1741 = vmatprep.subr.bf16.mxu0 %v4250_v55  ;;  %1913 = vmatprep.subr.bf16.mxu1 %v4253_v56 }
  0xaf   :  { %1742 = vmatpush1.bf16.msra.mxu0 %v4248_v57  ;;  %1914 = vmatpush1.bf16.msra.mxu1 %v4251_v58 }
  0xb0   :  { %1743 = vmatprep.subr.bf16.mxu0 %v4256_v59  ;;  %1915 = vmatprep.subr.bf16.mxu1 %v4259_v60 }
  0xb3   :  { %1744 = vmatpush1.bf16.msra.mxu0 %v4254_v61  ;;  %1916 = vmatpush1.bf16.msra.mxu1 %v4257_v62 }
  0xb4   :  { %1745 = vmatprep.subr.bf16.mxu0 %v4262_v63  ;;  %1917 = vmatprep.subr.bf16.mxu1 %v4265_v0 }
  0xb7   :  { %1746 = vmatpush1.bf16.msra.mxu0 %v4260_v1  ;;  %1918 = vmatpush1.bf16.msra.mxu1 %v4263_v2 }
  0xb8   :  { %1747 = vmatprep.subr.bf16.mxu0 %v4268_v3  ;;  %1919 = vmatprep.subr.bf16.mxu1 %v4271_v4 }
  0xbb   :  { %1748 = vmatpush1.bf16.msra.mxu0 %v4266_v5  ;;  %1920 = vmatpush1.bf16.msra.mxu1 %v4269_v6 }
  0xbc   :  { %1749 = vmatprep.subr.bf16.mxu0 %v4274_v7  ;;  %1921 = vmatprep.subr.bf16.mxu1 %v4277_v8 }
  0xbf   :  { %1750 = vmatpush1.bf16.msra.mxu0 %v4272_v9  ;;  %1922 = vmatpush1.bf16.msra.mxu1 %v4275_v10 }
  0xc0   :  { %1762 = vmatprep.subr.bf16.mxu0 %v4280_v11  ;;  %1934 = vmatprep.subr.bf16.mxu1 %v4283_v12 }
  0xc2   :  { %1752 = vmatmul.mubr.bf16.vlgmr.msra.gmra.mrb[0].mxu0 %v3495_v17  ;;  %1924 = vmatmul.mubr.bf16.vlgmr.msra.gmra.mrb[0].mxu1 %v3495_v17 }
  0xc3   :  { %1763 = vmatpush1.bf16.msra.mxu0 %v4278_v13  ;;  %1935 = vmatpush1.bf16.msra.mxu1 %v4281_v16 }
  0xc4   :  { %1764 = vmatprep.subr.bf16.mxu0 %v4286_v18  ;;  %1936 = vmatprep.subr.bf16.mxu1 %v4289_v14 }
  0xc5   :  { %1794 = vmatprep.mubr.bf16.mxu0 %v3498_v22  ;;  %1966 = vmatprep.mubr.bf16.mxu1 %v3498_v22 }
  0xc7   :  { %1765 = vmatpush1.bf16.msra.mxu0 %v4284_v15  ;;  %1937 = vmatpush1.bf16.msra.mxu1 %v4287_v21 }
  0xc8   :  { %1766 = vmatprep.subr.bf16.mxu0 %v4292_v23  ;;  %1938 = vmatprep.subr.bf16.mxu1 %v4295_v24 }
  0xcb   :  { %1767 = vmatpush1.bf16.msra.mxu0 %v4290_v25  ;;  %1939 = vmatpush1.bf16.msra.mxu1 %v4293_v26 }
  0xcc   :  { %12 = vsyncpa [#allocation3], 0  ;;  %1768 = vmatprep.subr.bf16.mxu0 %v4298_v27  ;;  %1940 = vmatprep.subr.bf16.mxu1 %v4301_v28  ;;  %v4304_v31 = vld [vmem:[%s5994_s1 + $0x684] ss:$16 sps:$4 sm:$0xff]   ;;  %v4307_v32 = vld [vmem:[%s5994_s1 + $0x68c] ss:$16 sps:$4 sm:$0xff]   ;;  %v3497_v18 = vcombine.low %v5165_v19, %v5170_v20 }
  0xcd   :  { %v4302_v33 = vld [vmem:[%s5994_s1 + $0x680] ss:$16 sps:$4 sm:$0xff]   ;;  %v4305_v34 = vld [vmem:[%s5994_s1 + $0x688] ss:$16 sps:$4 sm:$0xff]   ;;  %v4310_v35 = vld [vmem:[%s5994_s1 + $0x6a4] ss:$16 sps:$4 sm:$0xff]  }
  0xce   :  { %v4313_v36 = vld [vmem:[%s5994_s1 + $0x6ac] ss:$16 sps:$4 sm:$0xff]   ;;  %v4308_v37 = vld [vmem:[%s5994_s1 + $0x6a0] ss:$16 sps:$4 sm:$0xff]   ;;  %v4311_v38 = vld [vmem:[%s5994_s1 + $0x6a8] ss:$16 sps:$4 sm:$0xff]  }
  0xcf   :  { %1769 = vmatpush1.bf16.msra.mxu0 %v4296_v29  ;;  %1941 = vmatpush1.bf16.msra.mxu1 %v4299_v30  ;;  %v4316_v39 = vld [vmem:[%s5994_s1 + $0x6c4] ss:$16 sps:$4 sm:$0xff]   ;;  %v4319_v40 = vld [vmem:[%s5994_s1 + $0x6cc] ss:$16 sps:$4 sm:$0xff]   ;;  %v4314_v41 = vld [vmem:[%s5994_s1 + $0x6c0] ss:$16 sps:$4 sm:$0xff]  }
  0xd0   :  { %1770 = vmatprep.subr.bf16.mxu0 %v4304_v31  ;;  %1942 = vmatprep.subr.bf16.mxu1 %v4307_v32  ;;  %v4317_v42 = vld [vmem:[%s5994_s1 + $0x6c8] ss:$16 sps:$4 sm:$0xff]   ;;  %v4322_v43 = vld [vmem:[%s5994_s1 + $0x6e4] ss:$16 sps:$4 sm:$0xff]   ;;  %v4325_v44 = vld [vmem:[%s5994_s1 + $0x6ec] ss:$16 sps:$4 sm:$0xff]  }
  0xd1   :  { %v4320_v45 = vld [vmem:[%s5994_s1 + $0x6e0] ss:$16 sps:$4 sm:$0xff]   ;;  %v4323_v46 = vld [vmem:[%s5994_s1 + $0x6e8] ss:$16 sps:$4 sm:$0xff]   ;;  %v4328_v47 = vld [vmem:[%s5994_s1 + $0x704] ss:$16 sps:$4 sm:$0xff]  }
  0xd2   :  { %v4331_v48 = vld [vmem:[%s5994_s1 + $0x70c] ss:$16 sps:$4 sm:$0xff]   ;;  %v4326_v49 = vld [vmem:[%s5994_s1 + $0x700] ss:$16 sps:$4 sm:$0xff]   ;;  %v4329_v50 = vld [vmem:[%s5994_s1 + $0x708] ss:$16 sps:$4 sm:$0xff]  }
  0xd3   :  { %1771 = vmatpush1.bf16.msra.mxu0 %v4302_v33  ;;  %1943 = vmatpush1.bf16.msra.mxu1 %v4305_v34  ;;  %v4334_v51 = vld [vmem:[%s5994_s1 + $0x724] ss:$16 sps:$4 sm:$0xff]   ;;  %v4337_v52 = vld [vmem:[%s5994_s1 + $0x72c] ss:$16 sps:$4 sm:$0xff]   ;;  %v4332_v53 = vld [vmem:[%s5994_s1 + $0x720] ss:$16 sps:$4 sm:$0xff]  }
  0xd4   :  { %1772 = vmatprep.subr.bf16.mxu0 %v4310_v35  ;;  %1944 = vmatprep.subr.bf16.mxu1 %v4313_v36  ;;  %v4335_v54 = vld [vmem:[%s5994_s1 + $0x728] ss:$16 sps:$4 sm:$0xff]   ;;  %v4340_v55 = vld [vmem:[%s5994_s1 + $0x744] ss:$16 sps:$4 sm:$0xff]   ;;  %v4343_v56 = vld [vmem:[%s5994_s1 + $0x74c] ss:$16 sps:$4 sm:$0xff]  }
  0xd5   :  { %v4338_v57 = vld [vmem:[%s5994_s1 + $0x740] ss:$16 sps:$4 sm:$0xff]   ;;  %v4341_v58 = vld [vmem:[%s5994_s1 + $0x748] ss:$16 sps:$4 sm:$0xff]   ;;  %v4346_v59 = vld [vmem:[%s5994_s1 + $0x764] ss:$16 sps:$4 sm:$0xff]  }
  0xd6   :  { %v4349_v60 = vld [vmem:[%s5994_s1 + $0x76c] ss:$16 sps:$4 sm:$0xff]   ;;  %v4344_v61 = vld [vmem:[%s5994_s1 + $0x760] ss:$16 sps:$4 sm:$0xff]   ;;  %v4347_v62 = vld [vmem:[%s5994_s1 + $0x768] ss:$16 sps:$4 sm:$0xff]  }
  0xd7   :  { %1773 = vmatpush1.bf16.msra.mxu0 %v4308_v37  ;;  %1945 = vmatpush1.bf16.msra.mxu1 %v4311_v38  ;;  %v4352_v63 = vld [vmem:[%s5994_s1 + $0x784] ss:$16 sps:$4 sm:$0xff]   ;;  %v4355_v0 = vld [vmem:[%s5994_s1 + $0x78c] ss:$16 sps:$4 sm:$0xff]   ;;  %v4350_v1 = vld [vmem:[%s5994_s1 + $0x780] ss:$16 sps:$4 sm:$0xff]  }
  0xd8   :  { %1774 = vmatprep.subr.bf16.mxu0 %v4316_v39  ;;  %1946 = vmatprep.subr.bf16.mxu1 %v4319_v40  ;;  %v4353_v2 = vld [vmem:[%s5994_s1 + $0x788] ss:$16 sps:$4 sm:$0xff]   ;;  %v4358_v3 = vld [vmem:[%s5994_s1 + $0x7a4] ss:$16 sps:$4 sm:$0xff]   ;;  %v4361_v4 = vld [vmem:[%s5994_s1 + $0x7ac] ss:$16 sps:$4 sm:$0xff]  }
  0xd9   :  { %v4356_v5 = vld [vmem:[%s5994_s1 + $0x7a0] ss:$16 sps:$4 sm:$0xff]   ;;  %v4359_v6 = vld [vmem:[%s5994_s1 + $0x7a8] ss:$16 sps:$4 sm:$0xff]   ;;  %v4364_v7 = vld [vmem:[%s5994_s1 + $0x7c4] ss:$16 sps:$4 sm:$0xff]  }
  0xda   :  { %v4367_v8 = vld [vmem:[%s5994_s1 + $0x7cc] ss:$16 sps:$4 sm:$0xff]   ;;  %v4362_v9 = vld [vmem:[%s5994_s1 + $0x7c0] ss:$16 sps:$4 sm:$0xff]   ;;  %v4365_v10 = vld [vmem:[%s5994_s1 + $0x7c8] ss:$16 sps:$4 sm:$0xff]  }
  0xdb   :  { %1775 = vmatpush1.bf16.msra.mxu0 %v4314_v41  ;;  %1947 = vmatpush1.bf16.msra.mxu1 %v4317_v42  ;;  %v4370_v11 = vld [vmem:[%s5994_s1 + $0x7e4] ss:$16 sps:$4 sm:$0xff]   ;;  %v4373_v12 = vld [vmem:[%s5994_s1 + $0x7ec] ss:$16 sps:$4 sm:$0xff]   ;;  %v4368_v13 = vld [vmem:[%s5994_s1 + $0x7e0] ss:$16 sps:$4 sm:$0xff]  }
  0xdc   :  { %1776 = vmatprep.subr.bf16.mxu0 %v4322_v43  ;;  %1948 = vmatprep.subr.bf16.mxu1 %v4325_v44  ;;  %v4371_v16 = vld [vmem:[%s5994_s1 + $0x7e8] ss:$16 sps:$4 sm:$0xff]   ;;  %v4376_v17 = vld [vmem:[%s5996_s3 + $0x4] ss:$8 sps:$4 sm:$0xff]   ;;  %v4379_v15 = vld [vmem:[%s5996_s3 + $0x14] ss:$8 sps:$4 sm:$0xff]  }
  0xdd   :  { %v4374_v14 = vld [vmem:[%s5996_s3] ss:$8 sps:$4 sm:$0xff]   ;;  %v4377_v21 = vld [vmem:[%s5996_s3 + $0x10] ss:$8 sps:$4 sm:$0xff]   ;;  %v4382_v19 = vld [vmem:[%s5996_s3 + $0x24] ss:$8 sps:$4 sm:$0xff]  }
  0xde   :  { %v4380_v20 = vld [vmem:[%s5996_s3 + $0x20] ss:$8 sps:$4 sm:$0xff]   ;;  %v4385_v22 = vld [vmem:[%s5996_s3 + $0x34] ss:$8 sps:$4 sm:$0xff]   ;;  %v4383_v23 = vld [vmem:[%s5996_s3 + $0x30] ss:$8 sps:$4 sm:$0xff]  }
  0xdf   :  { %1777 = vmatpush1.bf16.msra.mxu0 %v4320_v45  ;;  %1949 = vmatpush1.bf16.msra.mxu1 %v4323_v46  ;;  %v4388_v24 = vld [vmem:[%s5996_s3 + $0x44] ss:$8 sps:$4 sm:$0xff]   ;;  %v4386_v25 = vld [vmem:[%s5996_s3 + $0x40] ss:$8 sps:$4 sm:$0xff]   ;;  %v4391_v26 = vld [vmem:[%s5996_s3 + $0x54] ss:$8 sps:$4 sm:$0xff]  }
  0xe0   :  { %1778 = vmatprep.subr.bf16.mxu0 %v4328_v47  ;;  %1950 = vmatprep.subr.bf16.mxu1 %v4331_v48  ;;  %v4389_v27 = vld [vmem:[%s5996_s3 + $0x50] ss:$8 sps:$4 sm:$0xff]   ;;  %v4394_v28 = vld [vmem:[%s5996_s3 + $0x64] ss:$8 sps:$4 sm:$0xff]   ;;  %v4392_v29 = vld [vmem:[%s5996_s3 + $0x60] ss:$8 sps:$4 sm:$0xff]  }
  0xe1   :  { %v4397_v30 = vld [vmem:[%s5996_s3 + $0x74] ss:$8 sps:$4 sm:$0xff]   ;;  %v4395_v31 = vld [vmem:[%s5996_s3 + $0x70] ss:$8 sps:$4 sm:$0xff]   ;;  %v4400_v32 = vld [vmem:[%s5996_s3 + $0x84] ss:$8 sps:$4 sm:$0xff]  }
  0xe2   :  { %v4398_v33 = vld [vmem:[%s5996_s3 + $0x80] ss:$8 sps:$4 sm:$0xff]   ;;  %v4403_v34 = vld [vmem:[%s5996_s3 + $0x94] ss:$8 sps:$4 sm:$0xff]   ;;  %v4401_v35 = vld [vmem:[%s5996_s3 + $0x90] ss:$8 sps:$4 sm:$0xff]  }
  0xe3   :  { %1779 = vmatpush1.bf16.msra.mxu0 %v4326_v49  ;;  %1951 = vmatpush1.bf16.msra.mxu1 %v4329_v50  ;;  %v4406_v36 = vld [vmem:[%s5996_s3 + $0xa4] ss:$8 sps:$4 sm:$0xff]   ;;  %v4404_v37 = vld [vmem:[%s5996_s3 + $0xa0] ss:$8 sps:$4 sm:$0xff]   ;;  %v4409_v38 = vld [vmem:[%s5996_s3 + $0xb4] ss:$8 sps:$4 sm:$0xff]  }
  0xe4   :  { %1780 = vmatprep.subr.bf16.mxu0 %v4334_v51  ;;  %1952 = vmatprep.subr.bf16.mxu1 %v4337_v52  ;;  %v4407_v39 = vld [vmem:[%s5996_s3 + $0xb0] ss:$8 sps:$4 sm:$0xff]   ;;  %v4412_v40 = vld [vmem:[%s5996_s3 + $0xc4] ss:$8 sps:$4 sm:$0xff]   ;;  %v4410_v41 = vld [vmem:[%s5996_s3 + $0xc0] ss:$8 sps:$4 sm:$0xff]  }
  0xe5   :  { %v4415_v42 = vld [vmem:[%s5996_s3 + $0xd4] ss:$8 sps:$4 sm:$0xff]   ;;  %v4413_v43 = vld [vmem:[%s5996_s3 + $0xd0] ss:$8 sps:$4 sm:$0xff]   ;;  %v4418_v44 = vld [vmem:[%s5996_s3 + $0xe4] ss:$8 sps:$4 sm:$0xff]  }
  0xe6   :  { %v4416_v45 = vld [vmem:[%s5996_s3 + $0xe0] ss:$8 sps:$4 sm:$0xff]   ;;  %v4421_v46 = vld [vmem:[%s5996_s3 + $0xf4] ss:$8 sps:$4 sm:$0xff]   ;;  %v4419_v47 = vld [vmem:[%s5996_s3 + $0xf0] ss:$8 sps:$4 sm:$0xff]  }
  0xe7   :  { %1781 = vmatpush1.bf16.msra.mxu0 %v4332_v53  ;;  %1953 = vmatpush1.bf16.msra.mxu1 %v4335_v54  ;;  %v4424_v48 = vld [vmem:[%s5996_s3 + $0x104] ss:$8 sps:$4 sm:$0xff]  }
  0xe8   :  { %1782 = vmatprep.subr.bf16.mxu0 %v4340_v55  ;;  %1954 = vmatprep.subr.bf16.mxu1 %v4343_v56  ;;  %v2477_v49 = vld [vmem:[%s5998_s5] sm:$0xff] }
  0xe9   :  { %v2481_v50 = vld [vmem:[%s5998_s5 + $0x20] sm:$0xff] }
  0xea   :  { %v3819_v51 = vcombine.low %v2477_v49, %v2481_v50  ;;  %v3820_v52 = vcombine.high %v2477_v49, %v2481_v50  ;;  %v2485_v53 = vld [vmem:[%s5998_s5 + $0x40] sm:$0xff] }
  0xeb   :  { %1783 = vmatpush1.bf16.msra.mxu0 %v4338_v57  ;;  %1955 = vmatpush1.bf16.msra.mxu1 %v4341_v58  ;;  %v2489_v54 = vld [vmem:[%s5998_s5 + $0x60] sm:$0xff] }
  0xec   :  { %1784 = vmatprep.subr.bf16.mxu0 %v4346_v59  ;;  %1956 = vmatprep.subr.bf16.mxu1 %v4349_v60  ;;  %v3828_v55 = vcombine.high %v2485_v53, %v2489_v54  ;;  %v3827_v56 = vcombine.low %v2485_v53, %v2489_v54  ;;  %v2493_v57 = vld [vmem:[%s5998_s5 + $0x80] sm:$0xff] }
  0xed   :  { %v2497_v58 = vld [vmem:[%s5998_s5 + $0xa0] sm:$0xff] }
  0xee   :  { %v3836_v59 = vcombine.high %v2493_v57, %v2497_v58  ;;  %v3835_v60 = vcombine.low %v2493_v57, %v2497_v58 }
  0xef   :  { %1785 = vmatpush1.bf16.msra.mxu0 %v4344_v61  ;;  %1957 = vmatpush1.bf16.msra.mxu1 %v4347_v62  ;;  %v2501_v61 = vld [vmem:[%s5998_s5 + $0xc0] sm:$0xff] }
  0xf0   :  { %1786 = vmatprep.subr.bf16.mxu0 %v4352_v63  ;;  %1958 = vmatprep.subr.bf16.mxu1 %v4355_v0  ;;  %v2505_v62 = vld [vmem:[%s5998_s5 + $0xe0] sm:$0xff] }
  0xf1   :  { %v3844_v63 = vcombine.high %v2501_v61, %v2505_v62  ;;  %v3843_v0 = vcombine.low %v2501_v61, %v2505_v62 }
  0xf3   :  { %1787 = vmatpush1.bf16.msra.mxu0 %v4350_v1  ;;  %1959 = vmatpush1.bf16.msra.mxu1 %v4353_v2  ;;  %v2509_v1 = vld [vmem:[%s5998_s5 + $0x100] sm:$0xff] }
  0xf4   :  { %1788 = vmatprep.subr.bf16.mxu0 %v4358_v3  ;;  %1960 = vmatprep.subr.bf16.mxu1 %v4361_v4  ;;  %v2513_v2 = vld [vmem:[%s5998_s5 + $0x120] sm:$0xff] }
  0xf5   :  { %v3852_v3 = vcombine.high %v2509_v1, %v2513_v2  ;;  %v3851_v4 = vcombine.low %v2509_v1, %v2513_v2 }
  0xf7   :  { %1789 = vmatpush1.bf16.msra.mxu0 %v4356_v5  ;;  %1961 = vmatpush1.bf16.msra.mxu1 %v4359_v6  ;;  %v2517_v5 = vld [vmem:[%s5998_s5 + $0x140] sm:$0xff] }
  0xf8   :  { %1790 = vmatprep.subr.bf16.mxu0 %v4364_v7  ;;  %1962 = vmatprep.subr.bf16.mxu1 %v4367_v8  ;;  %v2521_v6 = vld [vmem:[%s5998_s5 + $0x160] sm:$0xff] }
  0xf9   :  { %v3860_v7 = vcombine.high %v2517_v5, %v2521_v6  ;;  %v3859_v8 = vcombine.low %v2517_v5, %v2521_v6 }
  0xfb   :  { %1791 = vmatpush1.bf16.msra.mxu0 %v4362_v9  ;;  %1963 = vmatpush1.bf16.msra.mxu1 %v4365_v10  ;;  %v2525_v9 = vld [vmem:[%s5998_s5 + $0x180] sm:$0xff] }
  0xfc   :  { %1792 = vmatprep.subr.bf16.mxu0 %v4370_v11  ;;  %1964 = vmatprep.subr.bf16.mxu1 %v4373_v12  ;;  %v2529_v10 = vld [vmem:[%s5998_s5 + $0x1a0] sm:$0xff] }
  0xfd   :  { %v3868_v11 = vcombine.high %v2525_v9, %v2529_v10  ;;  %v3867_v12 = vcombine.low %v2525_v9, %v2529_v10 }
  0xff   :  { %1793 = vmatpush1.bf16.msra.mxu0 %v4368_v13  ;;  %1965 = vmatpush1.bf16.msra.mxu1 %v4371_v16  ;;  %v2533_v13 = vld [vmem:[%s5998_s5 + $0x1c0] sm:$0xff] }
 0x100   :  { %2385 = vmatprep.subr.bf16.mxu0 %v4376_v17  ;;  %3287 = vmatprep.subr.bf16.mxu1 %v3820_v52  ;;  %v2537_v16 = vld [vmem:[%s5998_s5 + $0x1e0] sm:$0xff] }
 0x101   :  { %v3876_v17 = vcombine.high %v2533_v13, %v2537_v16 }
 0x102   :  { %1795 = vmatmul.mubr.bf16.vlgmr.msra.gmra.mrb[0].mxu0 %v3497_v18  ;;  %1967 = vmatmul.mubr.bf16.vlgmr.msra.gmra.mrb[0].mxu1 %v3497_v18  ;;  %v3875_v18 = vcombine.low %v2533_v13, %v2537_v16 }
 0x103   :  { %2386 = vmatpush1.bf16.msra.mxu0 %v4374_v14  ;;  %3288 = vmatpush1.bf16.msra.mxu1 %v3819_v51  ;;  %v2541_v14 = vld [vmem:[%s5998_s5 + $0x200] sm:$0xff] }
 0x104   :  { %2387 = vmatprep.subr.bf16.mxu0 %v4379_v15  ;;  %3289 = vmatprep.subr.bf16.mxu1 %v3828_v55  ;;  %v2545_v15 = vld [vmem:[%s5998_s5 + $0x220] sm:$0xff] }
 0x107   :  { %2388 = vmatpush1.bf16.msra.mxu0 %v4377_v21  ;;  %3290 = vmatpush1.bf16.msra.mxu1 %v3827_v56  ;;  %v3884_v21 = vcombine.high %v2541_v14, %v2545_v15 }
 0x108   :  { %2389 = vmatprep.subr.bf16.mxu0 %v4382_v19  ;;  %3291 = vmatprep.subr.bf16.mxu1 %v3836_v59  ;;  %v3883_v19 = vcombine.low %v2541_v14, %v2545_v15  ;;  %v4427_v14 = vld [vmem:[%s5996_s3 + $0x114] ss:$8 sps:$4 sm:$0xff]   ;;  %v4425_v15 = vld [vmem:[%s5996_s3 + $0x110] ss:$8 sps:$4 sm:$0xff]  }
 0x10b   :  { %2390 = vmatpush1.bf16.msra.mxu0 %v4380_v20  ;;  %3292 = vmatpush1.bf16.msra.mxu1 %v3835_v60  ;;  %v2549_v20 = vld [vmem:[%s5998_s5 + $0x240] sm:$0xff] }
 0x10c   :  { %2391 = vmatprep.subr.bf16.mxu0 %v4385_v22  ;;  %3293 = vmatprep.subr.bf16.mxu1 %v3844_v63  ;;  %v2553_v22 = vld [vmem:[%s5998_s5 + $0x260] sm:$0xff] }
 0x10f   :  { %2392 = vmatpush1.bf16.msra.mxu0 %v4383_v23  ;;  %3294 = vmatpush1.bf16.msra.mxu1 %v3843_v0  ;;  %v3892_v23 = vcombine.high %v2549_v20, %v2553_v22 }
 0x110   :  { %2393 = vmatprep.subr.bf16.mxu0 %v4388_v24  ;;  %3295 = vmatprep.subr.bf16.mxu1 %v3852_v3  ;;  %v3891_v24 = vcombine.low %v2549_v20, %v2553_v22  ;;  %v4433_v20 = vld [vmem:[%s5996_s3 + $0x134] ss:$8 sps:$4 sm:$0xff]   ;;  %v4431_v22 = vld [vmem:[%s5996_s3 + $0x130] ss:$8 sps:$4 sm:$0xff]  }
 0x113   :  { %2394 = vmatpush1.bf16.msra.mxu0 %v4386_v25  ;;  %3296 = vmatpush1.bf16.msra.mxu1 %v3851_v4  ;;  %v2557_v25 = vld [vmem:[%s5998_s5 + $0x280] sm:$0xff] }
 0x114   :  { %2395 = vmatprep.subr.bf16.mxu0 %v4391_v26  ;;  %3297 = vmatprep.subr.bf16.mxu1 %v3860_v7  ;;  %v2561_v26 = vld [vmem:[%s5998_s5 + $0x2a0] sm:$0xff] }
 0x117   :  { %2396 = vmatpush1.bf16.msra.mxu0 %v4389_v27  ;;  %3298 = vmatpush1.bf16.msra.mxu1 %v3859_v8  ;;  %v293_v27 = vlaneseq }
 0x118   :  { %2397 = vmatprep.subr.bf16.mxu0 %v4394_v28  ;;  %3299 = vmatprep.subr.bf16.mxu1 %v3868_v11  ;;  %v3900_v28 = vcombine.high %v2557_v25, %v2561_v26 }
 0x11b   :  { %2398 = vmatpush1.bf16.msra.mxu0 %v4392_v29  ;;  %3300 = vmatpush1.bf16.msra.mxu1 %v3867_v12  ;;  %v3899_v29 = vcombine.low %v2557_v25, %v2561_v26  ;;  %v4439_v25 = vld [vmem:[%s5996_s3 + $0x154] ss:$8 sps:$4 sm:$0xff]   ;;  %v4437_v26 = vld [vmem:[%s5996_s3 + $0x150] ss:$8 sps:$4 sm:$0xff]  }
 0x11c   :  { %2399 = vmatprep.subr.bf16.mxu0 %v4397_v30  ;;  %3301 = vmatprep.subr.bf16.mxu1 %v3876_v17  ;;  %v2565_v30 = vld [vmem:[%s5998_s5 + $0x2c0] sm:$0xff] }
 0x11f   :  { %2400 = vmatpush1.bf16.msra.mxu0 %v4395_v31  ;;  %3302 = vmatpush1.bf16.msra.mxu1 %v3875_v18  ;;  %v2569_v31 = vld [vmem:[%s5998_s5 + $0x2e0] sm:$0xff] }
 0x120   :  { %2401 = vmatprep.subr.bf16.mxu0 %v4400_v32  ;;  %3303 = vmatprep.subr.bf16.mxu1 %v3884_v21  ;;  %v5524_v32 = vshrl.u32 %v293_v27, 7  ;;  %v4422_v18 = vld [vmem:[%s5996_s3 + $0x100] ss:$8 sps:$4 sm:$0xff]   ;;  %v4430_v21 = vld [vmem:[%s5996_s3 + $0x124] ss:$8 sps:$4 sm:$0xff]  }
 0x121   :  { %v4442_v27 = vld [vmem:[%s5996_s3 + $0x164] ss:$8 sps:$4 sm:$0xff]  }
 0x123   :  { %2402 = vmatpush1.bf16.msra.mxu0 %v4398_v33  ;;  %3304 = vmatpush1.bf16.msra.mxu1 %v3883_v19  ;;  %v3908_v33 = vcombine.high %v2565_v30, %v2569_v31  ;;  %v4428_v19 = vld [vmem:[%s5996_s3 + $0x120] ss:$8 sps:$4 sm:$0xff]  }
 0x124   :  { %2403 = vmatprep.subr.bf16.mxu0 %v4403_v34  ;;  %3305 = vmatprep.subr.bf16.mxu1 %v3892_v23  ;;  %v3907_v34 = vcombine.low %v2565_v30, %v2569_v31  ;;  %v4436_v23 = vld [vmem:[%s5996_s3 + $0x144] ss:$8 sps:$4 sm:$0xff]   ;;  %v4443_v30 = vld [vmem:[%s5996_s3 + $0x170] ss:$8 sps:$4 sm:$0xff]  }
 0x125   :  { %v4448_v31 = vld [vmem:[%s5996_s3 + $0x184] ss:$8 sps:$4 sm:$0xff]  }
 0x127   :  { %2404 = vmatpush1.bf16.msra.mxu0 %v4401_v35  ;;  %3306 = vmatpush1.bf16.msra.mxu1 %v3891_v24  ;;  %v2573_v35 = vld [vmem:[%s5998_s5 + $0x300] sm:$0xff] }
 0x128   :  { %2405 = vmatprep.subr.bf16.mxu0 %v4406_v36  ;;  %3307 = vmatprep.subr.bf16.mxu1 %v3900_v28  ;;  %v2577_v36 = vld [vmem:[%s5998_s5 + $0x320] sm:$0xff] }
 0x129   :  { %v4434_v24 = vld [vmem:[%s5996_s3 + $0x140] ss:$8 sps:$4 sm:$0xff]  }
 0x12a   :  { %v4440_v28 = vld [vmem:[%s5996_s3 + $0x160] ss:$8 sps:$4 sm:$0xff]  }
 0x12b   :  { %2406 = vmatpush1.bf16.msra.mxu0 %v4404_v37  ;;  %3308 = vmatpush1.bf16.msra.mxu1 %v3899_v29  ;;  %v5533_v37 = vsub.s32 0, %v5524_v32  ;;  %v4445_v29 = vld [vmem:[%s5996_s3 + $0x174] ss:$8 sps:$4 sm:$0xff]  }
 0x12c   :  { %2407 = vmatprep.subr.bf16.mxu0 %v4409_v38  ;;  %3309 = vmatprep.subr.bf16.mxu1 %v3908_v33  ;;  %v303_v38 = vsub.s32 2, %v5524_v32  ;;  %v4446_v33 = vld [vmem:[%s5996_s3 + $0x180] ss:$8 sps:$4 sm:$0xff]  }
 0x12f   :  { %2408 = vmatpush1.bf16.msra.mxu0 %v4407_v39  ;;  %v3916_v39 = vcombine.high %v2573_v35, %v2577_v36  ;;  %3310 = vmatpush1.bf16.msra.mxu1 %v3907_v34  ;;  %v4451_v34 = vld [vmem:[%s5996_s3 + $0x194] ss:$8 sps:$4 sm:$0xff]  }
 0x130   :  { %2409 = vmatprep.subr.bf16.mxu0 %v4412_v40  ;;  %v291_v40 = vld [vmem:[%s5995_s2] sm:$0xf] }
 0x131   :  { %3311 = vmatprep.subr.bf16.mxu1 %v3916_v39  ;;  %v4452_v39 = vld [vmem:[%s5996_s3 + $0x1a0] ss:$8 sps:$4 sm:$0xff]  }
 0x133   :  { %2410 = vmatpush1.bf16.msra.mxu0 %v4410_v41  ;;  %v5540_v41 = vsub.s32 1, %v5524_v32 }
 0x134   :  { %2411 = vmatprep.subr.bf16.mxu0 %v4415_v42  ;;  %v307_v42 = vsub.s32 3, %v5524_v32 }
 0x135   :  { %v300_v49 = vrot.slane %v291_v40, %v5540_v41 }
 0x136   :  { %v308_v50 = vrot.slane %v291_v40, %v307_v42 }
 0x137   :  { %2412 = vmatpush1.bf16.msra.mxu0 %v4413_v43  ;;  %v3915_v43 = vcombine.low %v2573_v35, %v2577_v36  ;;  %v4449_v35 = vld [vmem:[%s5996_s3 + $0x190] ss:$8 sps:$4 sm:$0xff]   ;;  %v4454_v36 = vld [vmem:[%s5996_s3 + $0x1a4] ss:$8 sps:$4 sm:$0xff]  }
 0x138   :  { %2413 = vmatprep.subr.bf16.mxu0 %v4418_v44  ;;  %v2581_v44 = vld [vmem:[%s5998_s5 + $0x340] sm:$0xff] }
 0x139   :  { %3312 = vmatpush1.bf16.msra.mxu1 %v3915_v43  ;;  %v4455_v43 = vld [vmem:[%s5996_s3 + $0x1b0] ss:$8 sps:$4 sm:$0xff]  }
 0x13b   :  { %2414 = vmatpush1.bf16.msra.mxu0 %v4416_v45  ;;  %v2585_v45 = vld [vmem:[%s5998_s5 + $0x360] sm:$0xff] }
 0x13c   :  { %2415 = vmatprep.subr.bf16.mxu0 %v4421_v46  ;;  %v296_v46 = vrot.slane %v291_v40, %v5533_v37  ;;  %v3923_v51 = vcombine.low %v2581_v44, %v2585_v45 }
 0x13f   :  { %2416 = vmatpush1.bf16.msra.mxu0 %v4419_v47  ;;  %v304_v47 = vrot.slane %v291_v40, %v303_v38  ;;  %v4457_v40 = vld [vmem:[%s5996_s3 + $0x1b4] ss:$8 sps:$4 sm:$0xff]  }
 0x140   :  { %2428 = vmatprep.subr.bf16.mxu0 %v4424_v48  ;;  %v3924_v48 = vcombine.high %v2581_v44, %v2585_v45  ;;  %v4460_v44 = vld [vmem:[%s5996_s3 + $0x1c4] ss:$8 sps:$4 sm:$0xff]   ;;  %v4458_v45 = vld [vmem:[%s5996_s3 + $0x1c0] ss:$8 sps:$4 sm:$0xff]  }
 0x142   :  { %3313 = vmatprep.subr.bf16.mxu1 %v3924_v48  ;;  %v4466_v48 = vld [vmem:[%s5996_s3 + $0x1e4] ss:$8 sps:$4 sm:$0xff]  }
 0x143   :  { %3314 = vmatpush1.bf16.msra.mxu1 %v3923_v51  ;;  %v2479_v51 = vld [vmem:[%s5998_s5 + $0x10] sm:$0xff] }
 0x1d5   :  { %v1796_v52 = vpop.f32.mrb[0].mxu0  ;;  %v1968_v53 = vpop.f32.mrb[0].mxu1 }
 0x1d6   :  { %v3947_v54 = vadd.f32 %v1796_v52, %v296_v46  ;;  %v3951_v55 = vadd.f32 %v1968_v53, %v304_v47  ;;  %v1798_v56 = vpop.f32.mrb[1].mxu0  ;;  %v1970_v57 = vpop.f32.mrb[1].mxu1  ;;  %v2483_v52 = vld [vmem:[%s5998_s5 + $0x30] sm:$0xff] }
 0x1d7   :  { %v3948_v58 = vadd.f32 %v1798_v56, %v300_v49  ;;  %v3952_v59 = vadd.f32 %v1970_v57, %v308_v50  ;;  %v1800_v60 = vpop.f32.mrb[2].mxu0  ;;  %v1972_v61 = vpop.f32.mrb[2].mxu1  ;;  %v4467_v53 = vld [vmem:[%s5996_s3 + $0x1f0] ss:$8 sps:$4 sm:$0xff]   ;;  %v3823_v57 = vcombine.low %v2479_v51, %v2483_v52 }
 0x1d8   :  { %v3949_v62 = vadd.f32 %v1800_v60, %v296_v46  ;;  %v3953_v63 = vadd.f32 %v1972_v61, %v304_v47  ;;  %v1802_v0 = vpop.f32.mrb[3].mxu0  ;;  %v1974_v1 = vpop.f32.mrb[3].mxu1  ;;  %v1977_v4 = vmax.f32 %v3947_v54, 0.0  ;;  %v1979_v5 = vmax.f32 %v3951_v55, 0.0  ;;  %v4463_v46 = vld [vmem:[%s5996_s3 + $0x1d4] ss:$8 sps:$4 sm:$0xff]  }
 0x1d9   :  { %v3950_v2 = vadd.f32 %v1802_v0, %v300_v49  ;;  %v3954_v3 = vadd.f32 %v1974_v1, %v308_v50  ;;  %v1978_v8 = vmax.f32 %v3948_v58, 0.0  ;;  %v1980_v9 = vmax.f32 %v3952_v59, 0.0  ;;  %v4461_v47 = vld [vmem:[%s5996_s3 + $0x1d0] ss:$8 sps:$4 sm:$0xff]   ;;  %v4464_v49 = vld [vmem:[%s5996_s3 + $0x1e0] ss:$8 sps:$4 sm:$0xff]  }
 0x1da   :  { %v1981_v6 = vmax.f32 %v3949_v62, 0.0  ;;  %v1983_v7 = vmax.f32 %v3953_v63, 0.0  ;;  %v4469_v50 = vld [vmem:[%s5996_s3 + $0x1f4] ss:$8 sps:$4 sm:$0xff]   ;;  %v3824_v54 = vcombine.high %v2479_v51, %v2483_v52 }
 0x1db   :  { %v1982_v10 = vmax.f32 %v3950_v2, 0.0  ;;  %v1984_v11 = vmax.f32 %v3954_v3, 0.0  ;;  %v2487_v55 = vld [vmem:[%s5998_s5 + $0x50] sm:$0xff] }
 0x1dc   :  { %v1985_v12 = vpack.c.bf16 %v1981_v6, %v1977_v4  ;;  %v5555_v13 = vpack.c.bf16 %v1983_v7, %v1979_v5  ;;  %v2491_v56 = vld [vmem:[%s5998_s5 + $0x70] sm:$0xff] }
 0x1dd   :  { %v1986_v16 = vpack.c.bf16 %v1982_v10, %v1978_v8  ;;  %v1988_v17 = vpack.c.bf16 %v1984_v11, %v1980_v9  ;;  %v3832_v58 = vcombine.high %v2487_v55, %v2491_v56  ;;  %v2495_v59 = vld [vmem:[%s5998_s5 + $0x90] sm:$0xff]  ;;  %v3831_v61 = vcombine.low %v2487_v55, %v2491_v56 }
 0x1de   :  { %v2499_v60 = vld [vmem:[%s5998_s5 + $0xb0] sm:$0xff] }
 0x1df   :  { %2417 = vmatprep.mubr.bf16.mxu0 %v1986_v16  ;;  %v3840_v62 = vcombine.high %v2495_v59, %v2499_v60  ;;  %v2503_v63 = vld [vmem:[%s5998_s5 + $0xd0] sm:$0xff]  ;;  %v3839_v1 = vcombine.low %v2495_v59, %v2499_v60 }
 0x1e0   :  { %2418 = vmatmul.mubr.bf16.vlgmr.msra.gmra.mrb[4].mxu0 %v1985_v12  ;;  %v2507_v0 = vld [vmem:[%s5998_s5 + $0xf0] sm:$0xff] }
 0x1e1   :  { %2429 = vmatpush1.bf16.msra.mxu0 %v4422_v18  ;;  %2460 = vmatprep.mubr.bf16.mxu0 %v1988_v17  ;;  %v3848_v2 = vcombine.high %v2503_v63, %v2507_v0  ;;  %v2511_v3 = vld [vmem:[%s5998_s5 + $0x110] sm:$0xff]  ;;  %v3847_v5 = vcombine.low %v2503_v63, %v2507_v0 }
 0x1e2   :  { %2430 = vmatprep.subr.bf16.mxu0 %v4427_v14  ;;  %v2515_v4 = vld [vmem:[%s5998_s5 + $0x130] sm:$0xff] }
 0x1e3   :  { %v3856_v6 = vcombine.high %v2511_v3, %v2515_v4  ;;  %v2519_v7 = vld [vmem:[%s5998_s5 + $0x150] sm:$0xff]  ;;  %v3855_v9 = vcombine.low %v2511_v3, %v2515_v4 }
 0x1e4   :  { %v2523_v8 = vld [vmem:[%s5998_s5 + $0x170] sm:$0xff] }
 0x1e5   :  { %2431 = vmatpush1.bf16.msra.mxu0 %v4425_v15  ;;  %v3864_v10 = vcombine.high %v2519_v7, %v2523_v8  ;;  %v2527_v11 = vld [vmem:[%s5998_s5 + $0x190] sm:$0xff] }
 0x1e6   :  { %2432 = vmatprep.subr.bf16.mxu0 %v4430_v21  ;;  %v2531_v12 = vld [vmem:[%s5998_s5 + $0x1b0] sm:$0xff] }
 0x1e7   :  { %v3872_v16 = vcombine.high %v2527_v11, %v2531_v12  ;;  %v2535_v17 = vld [vmem:[%s5998_s5 + $0x1d0] sm:$0xff]  ;;  %v3871_v14 = vcombine.low %v2527_v11, %v2531_v12 }
 0x1e8   :  { %v2539_v18 = vld [vmem:[%s5998_s5 + $0x1f0] sm:$0xff] }
 0x1e9   :  { %2433 = vmatpush1.bf16.msra.mxu0 %v4428_v19  ;;  %v3880_v15 = vcombine.high %v2535_v17, %v2539_v18  ;;  %v2543_v21 = vld [vmem:[%s5998_s5 + $0x210] sm:$0xff] }
 0x1ea   :  { %2434 = vmatprep.subr.bf16.mxu0 %v4433_v20  ;;  %v2547_v19 = vld [vmem:[%s5998_s5 + $0x230] sm:$0xff]  ;;  %v3879_v20 = vcombine.low %v2535_v17, %v2539_v18 }
 0x1eb   :  { %v2591_v52 = vld [vmem:[%s5998_s5 + $0x390] sm:$0xff] }
 0x1ec   :  { %v2599_v60 = vld [vmem:[%s5998_s5 + $0x3d0] sm:$0xff] }
 0x1ed   :  { %2435 = vmatpush1.bf16.msra.mxu0 %v4431_v22  ;;  %v3888_v22 = vcombine.high %v2543_v21, %v2547_v19 }
 0x1ee   :  { %2436 = vmatprep.subr.bf16.mxu0 %v4436_v23  ;;  %v2551_v23 = vld [vmem:[%s5998_s5 + $0x250] sm:$0xff] }
 0x1f1   :  { %2437 = vmatpush1.bf16.msra.mxu0 %v4434_v24  ;;  %v2555_v24 = vld [vmem:[%s5998_s5 + $0x270] sm:$0xff] }
 0x1f2   :  { %2438 = vmatprep.subr.bf16.mxu0 %v4439_v25  ;;  %v3887_v25 = vcombine.low %v2543_v21, %v2547_v19  ;;  %v2486_v19 = vld [vmem:[%s5998_s5 + $0x48] sm:$0xff] }
 0x1f5   :  { %2439 = vmatpush1.bf16.msra.mxu0 %v4437_v26  ;;  %v3896_v26 = vcombine.high %v2551_v23, %v2555_v24 }
 0x1f6   :  { %2440 = vmatprep.subr.bf16.mxu0 %v4442_v27  ;;  %v2559_v27 = vld [vmem:[%s5998_s5 + $0x290] sm:$0xff] }
 0x1f9   :  { %2441 = vmatpush1.bf16.msra.mxu0 %v4440_v28  ;;  %v2563_v28 = vld [vmem:[%s5998_s5 + $0x2b0] sm:$0xff] }
 0x1fa   :  { %2442 = vmatprep.subr.bf16.mxu0 %v4445_v29  ;;  %v3895_v29 = vcombine.low %v2551_v23, %v2555_v24 }
 0x1fd   :  { %2443 = vmatpush1.bf16.msra.mxu0 %v4443_v30  ;;  %v3904_v30 = vcombine.high %v2559_v27, %v2563_v28 }
 0x1fe   :  { %2444 = vmatprep.subr.bf16.mxu0 %v4448_v31  ;;  %v2567_v31 = vld [vmem:[%s5998_s5 + $0x2d0] sm:$0xff] }
 0x201   :  { %2445 = vmatpush1.bf16.msra.mxu0 %v4446_v33  ;;  %v2571_v33 = vld [vmem:[%s5998_s5 + $0x2f0] sm:$0xff] }
 0x202   :  { %2446 = vmatprep.subr.bf16.mxu0 %v4451_v34  ;;  %v3903_v34 = vcombine.low %v2559_v27, %v2563_v28 }
 0x205   :  { %2447 = vmatpush1.bf16.msra.mxu0 %v4449_v35  ;;  %v3912_v35 = vcombine.high %v2567_v31, %v2571_v33 }
 0x206   :  { %2448 = vmatprep.subr.bf16.mxu0 %v4454_v36  ;;  %v2575_v36 = vld [vmem:[%s5998_s5 + $0x310] sm:$0xff] }
 0x209   :  { %2449 = vmatpush1.bf16.msra.mxu0 %v4452_v39  ;;  %v2579_v39 = vld [vmem:[%s5998_s5 + $0x330] sm:$0xff] }
 0x20a   :  { %2450 = vmatprep.subr.bf16.mxu0 %v4457_v40  ;;  %v3911_v40 = vcombine.low %v2567_v31, %v2571_v33 }
 0x20d   :  { %2451 = vmatpush1.bf16.msra.mxu0 %v4455_v43  ;;  %v3920_v43 = vcombine.high %v2575_v36, %v2579_v39 }
 0x20e   :  { %2452 = vmatprep.subr.bf16.mxu0 %v4460_v44  ;;  %v2583_v44 = vld [vmem:[%s5998_s5 + $0x350] sm:$0xff] }
 0x211   :  { %2453 = vmatpush1.bf16.msra.mxu0 %v4458_v45  ;;  %v2587_v45 = vld [vmem:[%s5998_s5 + $0x370] sm:$0xff] }
 0x212   :  { %2454 = vmatprep.subr.bf16.mxu0 %v4463_v46  ;;  %v3919_v46 = vcombine.low %v2575_v36, %v2579_v39 }
 0x215   :  { %2455 = vmatpush1.bf16.msra.mxu0 %v4461_v47  ;;  %v3928_v47 = vcombine.high %v2583_v44, %v2587_v45 }
 0x216   :  { %2456 = vmatprep.subr.bf16.mxu0 %v4466_v48  ;;  %v3927_v48 = vcombine.low %v2583_v44, %v2587_v45 }
 0x219   :  { %2457 = vmatpush1.bf16.msra.mxu0 %v4464_v49  ;;  %v2589_v49 = vld [vmem:[%s5998_s5 + $0x380] sm:$0xff] }
 0x21a   :  { %2458 = vmatprep.subr.bf16.mxu0 %v4469_v50  ;;  %v2593_v50 = vld [vmem:[%s5998_s5 + $0x3a0] sm:$0xff] }
 0x21b   :  { %v3932_v51 = vcombine.high %v2589_v49, %v2593_v50 }
 0x21d   :  { %2459 = vmatpush1.bf16.msra.mxu0 %v4467_v53  ;;  %v2595_v53 = vld [vmem:[%s5998_s5 + $0x3b0] sm:$0xff]  ;;  %3315 = vmatprep.subr.bf16.mxu1 %v3932_v51  ;;  %v2538_v51 = vld [vmem:[%s5998_s5 + $0x1e8] sm:$0xff] }
 0x21e   :  { %3373 = vmatprep.subr.bf16.mxu0 %v3824_v54  ;;  %v3931_v54 = vcombine.low %v2589_v49, %v2593_v50  ;;  %v3936_v55 = vcombine.high %v2591_v52, %v2595_v53  ;;  %v3935_v56 = vcombine.low %v2591_v52, %v2595_v53  ;;  %v2534_v50 = vld [vmem:[%s5998_s5 + $0x1c8] sm:$0xff] }
 0x21f   :  { %v3878_v53 = vcombine.high %v2534_v50, %v2538_v51 }
 0x220   :  { %2461 = vmatmul.mubr.bf16.vlgmr.msra.gmra.mrb[4].mxu0 %v5555_v13  ;;  %v3863_v13 = vcombine.low %v2519_v7, %v2523_v8  ;;  %3316 = vmatpush1.bf16.msra.mxu1 %v3931_v54  ;;  %v2542_v54 = vld [vmem:[%s5998_s5 + $0x208] sm:$0xff] }
 0x221   :  { %3374 = vmatpush1.bf16.msra.mxu0 %v3823_v57  ;;  %v2597_v57 = vld [vmem:[%s5998_s5 + $0x3c0] sm:$0xff] }
 0x222   :  { %3375 = vmatprep.subr.bf16.mxu0 %v3832_v58  ;;  %v2601_v58 = vld [vmem:[%s5998_s5 + $0x3e0] sm:$0xff] }
 0x223   :  { %v3940_v59 = vcombine.high %v2597_v57, %v2601_v58 }
 0x225   :  { %3376 = vmatpush1.bf16.msra.mxu0 %v3831_v61  ;;  %v2603_v61 = vld [vmem:[%s5998_s5 + $0x3f0] sm:$0xff]  ;;  %3317 = vmatprep.subr.bf16.mxu1 %v3940_v59  ;;  %v2554_v59 = vld [vmem:[%s5998_s5 + $0x268] sm:$0xff] }
 0x226   :  { %3377 = vmatprep.subr.bf16.mxu0 %v3840_v62  ;;  %v3939_v62 = vcombine.low %v2597_v57, %v2601_v58  ;;  %v3944_v63 = vcombine.high %v2599_v60, %v2603_v61  ;;  %v3943_v0 = vcombine.low %v2599_v60, %v2603_v61  ;;  %v2550_v58 = vld [vmem:[%s5998_s5 + $0x248] sm:$0xff] }
 0x227   :  { %v3894_v61 = vcombine.high %v2550_v58, %v2554_v59 }
 0x228   :  { %3318 = vmatpush1.bf16.msra.mxu1 %v3939_v62  ;;  %v2558_v62 = vld [vmem:[%s5998_s5 + $0x288] sm:$0xff] }
 0x229   :  { %3378 = vmatpush1.bf16.msra.mxu0 %v3839_v1  ;;  %v2478_v1 = vld [vmem:[%s5998_s5 + $0x8] sm:$0xff] }
 0x22a   :  { %3379 = vmatprep.subr.bf16.mxu0 %v3848_v2  ;;  %v2482_v2 = vld [vmem:[%s5998_s5 + $0x28] sm:$0xff] }
 0x22b   :  { %v3822_v3 = vcombine.high %v2478_v1, %v2482_v2  ;;  %v3821_v4 = vcombine.low %v2478_v1, %v2482_v2  ;;  %v2566_v2 = vld [vmem:[%s5998_s5 + $0x2c8] sm:$0xff] }
 0x22d   :  { %3380 = vmatpush1.bf16.msra.mxu0 %v3847_v5  ;;  %3330 = vmatprep.subr.bf16.mxu1 %v3822_v3  ;;  %v2053_v5 = vld [vmem:[%s5997_s4] sm:$0x3]  ;;  %v2570_v3 = vld [vmem:[%s5998_s5 + $0x2e8] sm:$0xff] }
 0x22e   :  { %3381 = vmatprep.subr.bf16.mxu0 %v3856_v6  ;;  %v2058_v6 = vrot.slane %v2053_v5, %v5533_v37  ;;  %v2062_v7 = vrot.slane %v2053_v5, %v5540_v41  ;;  %v3910_v5 = vcombine.high %v2566_v2, %v2570_v3 }
 0x231   :  { %3382 = vmatpush1.bf16.msra.mxu0 %v3855_v9 }
 0x232   :  { %3383 = vmatprep.subr.bf16.mxu0 %v3864_v10 }
 0x235   :  { %3384 = vmatpush1.bf16.msra.mxu0 %v3863_v13 }
 0x236   :  { %3385 = vmatprep.subr.bf16.mxu0 %v3872_v16 }
 0x239   :  { %3386 = vmatpush1.bf16.msra.mxu0 %v3871_v14 }
 0x23a   :  { %3387 = vmatprep.subr.bf16.mxu0 %v3880_v15 }
 0x23d   :  { %3388 = vmatpush1.bf16.msra.mxu0 %v3879_v20  ;;  %v2490_v20 = vld [vmem:[%s5998_s5 + $0x68] sm:$0xff] }
 0x23e   :  { %3389 = vmatprep.subr.bf16.mxu0 %v3888_v22  ;;  %v3830_v24 = vcombine.high %v2486_v19, %v2490_v20  ;;  %v3829_v27 = vcombine.low %v2486_v19, %v2490_v20 }
 0x241   :  { %3390 = vmatpush1.bf16.msra.mxu0 %v3887_v25  ;;  %v2494_v25 = vld [vmem:[%s5998_s5 + $0x88] sm:$0xff] }
 0x242   :  { %3391 = vmatprep.subr.bf16.mxu0 %v3896_v26  ;;  %v2498_v26 = vld [vmem:[%s5998_s5 + $0xa8] sm:$0xff] }
 0x243   :  { %v3838_v28 = vcombine.high %v2494_v25, %v2498_v26  ;;  %v3837_v31 = vcombine.low %v2494_v25, %v2498_v26  ;;  %v2484_v25 = vld [vmem:[%s5998_s5 + $0x38] sm:$0xff] }
 0x245   :  { %3392 = vmatpush1.bf16.msra.mxu0 %v3895_v29  ;;  %v2502_v29 = vld [vmem:[%s5998_s5 + $0xc8] sm:$0xff] }
 0x246   :  { %3393 = vmatprep.subr.bf16.mxu0 %v3904_v30  ;;  %v2506_v30 = vld [vmem:[%s5998_s5 + $0xe8] sm:$0xff] }
 0x247   :  { %v3846_v33 = vcombine.high %v2502_v29, %v2506_v30  ;;  %v3845_v36 = vcombine.low %v2502_v29, %v2506_v30  ;;  %v2492_v29 = vld [vmem:[%s5998_s5 + $0x78] sm:$0xff] }
 0x249   :  { %3394 = vmatpush1.bf16.msra.mxu0 %v3903_v34  ;;  %v2510_v34 = vld [vmem:[%s5998_s5 + $0x108] sm:$0xff] }
 0x24a   :  { %3395 = vmatprep.subr.bf16.mxu0 %v3912_v35  ;;  %v2514_v35 = vld [vmem:[%s5998_s5 + $0x128] sm:$0xff] }
 0x24b   :  { %v3854_v39 = vcombine.high %v2510_v34, %v2514_v35  ;;  %v3853_v44 = vcombine.low %v2510_v34, %v2514_v35  ;;  %v2500_v34 = vld [vmem:[%s5998_s5 + $0xb8] sm:$0xff] }
 0x24d   :  { %3396 = vmatpush1.bf16.msra.mxu0 %v3911_v40  ;;  %v2518_v40 = vld [vmem:[%s5998_s5 + $0x148] sm:$0xff] }
 0x24e   :  { %3397 = vmatprep.subr.bf16.mxu0 %v3920_v43  ;;  %v2522_v43 = vld [vmem:[%s5998_s5 + $0x168] sm:$0xff] }
 0x24f   :  { %v3862_v45 = vcombine.high %v2518_v40, %v2522_v43 }
 0x251   :  { %3398 = vmatpush1.bf16.msra.mxu0 %v3919_v46  ;;  %v2526_v46 = vld [vmem:[%s5998_s5 + $0x188] sm:$0xff] }
 0x252   :  { %3399 = vmatprep.subr.bf16.mxu0 %v3928_v47  ;;  %v2530_v47 = vld [vmem:[%s5998_s5 + $0x1a8] sm:$0xff] }
 0x253   :  { %v3870_v49 = vcombine.high %v2526_v46, %v2530_v47  ;;  %v3869_v52 = vcombine.low %v2526_v46, %v2530_v47 }
 0x255   :  { %3400 = vmatpush1.bf16.msra.mxu0 %v3927_v48  ;;  %v3861_v48 = vcombine.low %v2518_v40, %v2522_v43  ;;  %v2508_v40 = vld [vmem:[%s5998_s5 + $0xf8] sm:$0xff] }
 0x256   :  { %3401 = vmatprep.subr.bf16.mxu0 %v3936_v55  ;;  %v2546_v55 = vld [vmem:[%s5998_s5 + $0x228] sm:$0xff] }
 0x257   :  { %v3886_v57 = vcombine.high %v2542_v54, %v2546_v55  ;;  %v3885_v60 = vcombine.low %v2542_v54, %v2546_v55 }
 0x259   :  { %3402 = vmatpush1.bf16.msra.mxu0 %v3935_v56  ;;  %v3877_v56 = vcombine.low %v2534_v50, %v2538_v51 }
 0x25a   :  { %3403 = vmatprep.subr.bf16.mxu0 %v3944_v63  ;;  %v2562_v63 = vld [vmem:[%s5998_s5 + $0x2a8] sm:$0xff] }
 0x25b   :  { %v3902_v1 = vcombine.high %v2558_v62, %v2562_v63 }
 0x25d   :  { %3404 = vmatpush1.bf16.msra.mxu0 %v3943_v0  ;;  %v3893_v0 = vcombine.low %v2550_v58, %v2554_v59 }
 0x2f3   :  { %v2462_v8 = vpop.f32.mrb[4].mxu0 }
 0x2f4   :  { %v3955_v9 = vadd.f32 %v2462_v8, %v2058_v6  ;;  %v2464_v10 = vpop.f32.mrb[5].mxu0  ;;  %v3909_v8 = vcombine.low %v2566_v2, %v2570_v3 }
 0x2f5   :  { %v3956_v11 = vadd.f32 %v2464_v10, %v2062_v7  ;;  %v2466_v12 = vpop.f32.mrb[6].mxu0  ;;  %v2582_v10 = vld [vmem:[%s5998_s5 + $0x348] sm:$0xff] }
 0x2f6   :  { %v3957_v13 = vadd.f32 %v2466_v12, %v2058_v6  ;;  %v2468_v16 = vpop.f32.mrb[7].mxu0  ;;  %v2471_v18 = vmax.f32 %v3955_v9, 0.0  ;;  %v2574_v6 = vld [vmem:[%s5998_s5 + $0x308] sm:$0xff] }
 0x2f7   :  { %v3958_v17 = vadd.f32 %v2468_v16, %v2062_v7  ;;  %v2472_v15 = vmax.f32 %v3956_v11, 0.0  ;;  %v2578_v7 = vld [vmem:[%s5998_s5 + $0x328] sm:$0xff] }
 0x2f8   :  { %v2473_v14 = vmax.f32 %v3957_v13, 0.0  ;;  %v3918_v9 = vcombine.high %v2574_v6, %v2578_v7  ;;  %v2586_v11 = vld [vmem:[%s5998_s5 + $0x368] sm:$0xff]  ;;  %v3917_v12 = vcombine.low %v2574_v6, %v2578_v7 }
 0x2f9   :  { %v2474_v21 = vmax.f32 %v3958_v17, 0.0  ;;  %v3926_v13 = vcombine.high %v2582_v10, %v2586_v11  ;;  %v2590_v16 = vld [vmem:[%s5998_s5 + $0x388] sm:$0xff] }
 0x2fa   :  { %v5776_v22 = vpack.c.bf16 %v2473_v14, %v2471_v18  ;;  %v2594_v17 = vld [vmem:[%s5998_s5 + $0x3a8] sm:$0xff]  ;;  %v3925_v18 = vcombine.low %v2582_v10, %v2586_v11 }
 0x2fb   :  { %v5778_v23 = vpack.c.bf16 %v2474_v21, %v2472_v15  ;;  %v3934_v14 = vcombine.high %v2590_v16, %v2594_v17  ;;  %v2598_v15 = vld [vmem:[%s5998_s5 + $0x3c8] sm:$0xff]  ;;  %v3933_v19 = vcombine.low %v2590_v16, %v2594_v17 }
 0x2fc   :  { %v2602_v21 = vld [vmem:[%s5998_s5 + $0x3e8] sm:$0xff] }
 0x2fd   :  { %3319 = vmatprep.mubr.bf16.mxu1 %v5778_v23  ;;  %3405 = vmatprep.mubr.bf16.mxu0 %v5778_v23  ;;  %v3942_v20 = vcombine.high %v2598_v15, %v2602_v21  ;;  %v3941_v26 = vcombine.low %v2598_v15, %v2602_v21 }
 0x2fe   :  { %3320 = vmatmul.mubr.bf16.vlgmr.msra.gmra.mrb[4].mxu1 %v5776_v22  ;;  %3406 = vmatmul.mubr.bf16.vlgmr.msra.gmra.mrb[8].mxu0 %v5776_v22 }
 0x2ff   :  { %3331 = vmatpush1.bf16.msra.mxu1 %v3821_v4  ;;  %3362 = vmatprep.mubr.bf16.mxu1 %v5778_v23  ;;  %v3901_v4 = vcombine.low %v2558_v62, %v2562_v63 }
 0x300   :  { %3332 = vmatprep.subr.bf16.mxu1 %v3830_v24  ;;  %v2480_v24 = vld [vmem:[%s5998_s5 + $0x18] sm:$0xff] }
 0x301   :  { %v3825_v30 = vcombine.low %v2480_v24, %v2484_v25 }
 0x303   :  { %3333 = vmatpush1.bf16.msra.mxu1 %v3829_v27  ;;  %v3826_v27 = vcombine.high %v2480_v24, %v2484_v25 }
 0x304   :  { %3334 = vmatprep.subr.bf16.mxu1 %v3838_v28  ;;  %v2488_v28 = vld [vmem:[%s5998_s5 + $0x58] sm:$0xff] }
 0x305   :  { %v3833_v35 = vcombine.low %v2488_v28, %v2492_v29 }
 0x307   :  { %3335 = vmatpush1.bf16.msra.mxu1 %v3837_v31  ;;  %v3834_v31 = vcombine.high %v2488_v28, %v2492_v29 }
 0x308   :  { %3336 = vmatprep.subr.bf16.mxu1 %v3846_v33  ;;  %v2496_v33 = vld [vmem:[%s5998_s5 + $0x98] sm:$0xff] }
 0x309   :  { %v3841_v43 = vcombine.low %v2496_v33, %v2500_v34 }
 0x30b   :  { %3337 = vmatpush1.bf16.msra.mxu1 %v3845_v36  ;;  %v3842_v36 = vcombine.high %v2496_v33, %v2500_v34  ;;  %v2605_v33 = vld [vmem:[%s5999_s6] sm:$0xff]  ;;  %v2629_v34 = vsub.s32 5, %v5524_v32 }
 0x30c   :  { %3338 = vmatprep.subr.bf16.mxu1 %v3854_v39  ;;  %v2504_v39 = vld [vmem:[%s5998_s5 + $0xd8] sm:$0xff] }
 0x30d   :  { %v3849_v46 = vcombine.low %v2504_v39, %v2508_v40 }
 0x30f   :  { %3339 = vmatpush1.bf16.msra.mxu1 %v3853_v44  ;;  %v3850_v44 = vcombine.high %v2504_v39, %v2508_v40  ;;  %v2614_v39 = vrot.slane %v2605_v33, %v5540_v41  ;;  %v2630_v40 = vrot.slane %v2605_v33, %v2629_v34 }
 0x310   :  { %3340 = vmatprep.subr.bf16.mxu1 %v3862_v45  ;;  %v2512_v45 = vld [vmem:[%s5998_s5 + $0x118] sm:$0xff] }
 0x313   :  { %3341 = vmatpush1.bf16.msra.mxu1 %v3861_v48  ;;  %v2520_v48 = vld [vmem:[%s5998_s5 + $0x158] sm:$0xff] }
 0x314   :  { %3342 = vmatprep.subr.bf16.mxu1 %v3870_v49  ;;  %v2524_v49 = vld [vmem:[%s5998_s5 + $0x178] sm:$0xff] }
 0x315   :  { %v3866_v51 = vcombine.high %v2520_v48, %v2524_v49  ;;  %v3865_v54 = vcombine.low %v2520_v48, %v2524_v49 }
 0x317   :  { %3343 = vmatpush1.bf16.msra.mxu1 %v3869_v52  ;;  %v2528_v52 = vld [vmem:[%s5998_s5 + $0x198] sm:$0xff] }
 0x318   :  { %3344 = vmatprep.subr.bf16.mxu1 %v3878_v53  ;;  %v2532_v53 = vld [vmem:[%s5998_s5 + $0x1b8] sm:$0xff] }
 0x319   :  { %v3874_v55 = vcombine.high %v2528_v52, %v2532_v53  ;;  %v3873_v58 = vcombine.low %v2528_v52, %v2532_v53 }
 0x31b   :  { %3345 = vmatpush1.bf16.msra.mxu1 %v3877_v56  ;;  %v2536_v56 = vld [vmem:[%s5998_s5 + $0x1d8] sm:$0xff] }
 0x31c   :  { %3346 = vmatprep.subr.bf16.mxu1 %v3886_v57  ;;  %v2540_v57 = vld [vmem:[%s5998_s5 + $0x1f8] sm:$0xff] }
 0x31d   :  { %v3882_v59 = vcombine.high %v2536_v56, %v2540_v57  ;;  %v3881_v62 = vcombine.low %v2536_v56, %v2540_v57  ;;  %v2622_v56 = vrot.slane %v2605_v33, %v307_v42 }
 0x31f   :  { %3347 = vmatpush1.bf16.msra.mxu1 %v3885_v60  ;;  %v2544_v60 = vld [vmem:[%s5998_s5 + $0x218] sm:$0xff] }
 0x320   :  { %3348 = vmatprep.subr.bf16.mxu1 %v3894_v61  ;;  %v2548_v61 = vld [vmem:[%s5998_s5 + $0x238] sm:$0xff] }
 0x321   :  { %v3890_v63 = vcombine.high %v2544_v60, %v2548_v61  ;;  %v3889_v2 = vcombine.low %v2544_v60, %v2548_v61 }
 0x323   :  { %3349 = vmatpush1.bf16.msra.mxu1 %v3893_v0  ;;  %v2552_v0 = vld [vmem:[%s5998_s5 + $0x258] sm:$0xff] }
 0x324   :  { %3350 = vmatprep.subr.bf16.mxu1 %v3902_v1  ;;  %v2556_v1 = vld [vmem:[%s5998_s5 + $0x278] sm:$0xff] }
 0x325   :  { %v3898_v3 = vcombine.high %v2552_v0, %v2556_v1  ;;  %v3897_v6 = vcombine.low %v2552_v0, %v2556_v1  ;;  %v2633_v1 = vsub.s32 6, %v5524_v32 }
 0x327   :  { %3351 = vmatpush1.bf16.msra.mxu1 %v3901_v4  ;;  %v2560_v4 = vld [vmem:[%s5998_s5 + $0x298] sm:$0xff] }
 0x328   :  { %3352 = vmatprep.subr.bf16.mxu1 %v3910_v5  ;;  %v2564_v5 = vld [vmem:[%s5998_s5 + $0x2b8] sm:$0xff] }
 0x329   :  { %v3906_v7 = vcombine.high %v2560_v4, %v2564_v5  ;;  %v3905_v10 = vcombine.low %v2560_v4, %v2564_v5 }
 0x32b   :  { %3353 = vmatpush1.bf16.msra.mxu1 %v3909_v8  ;;  %v2568_v8 = vld [vmem:[%s5998_s5 + $0x2d8] sm:$0xff] }
 0x32c   :  { %3354 = vmatprep.subr.bf16.mxu1 %v3918_v9  ;;  %v2572_v9 = vld [vmem:[%s5998_s5 + $0x2f8] sm:$0xff] }
 0x32d   :  { %v3914_v11 = vcombine.high %v2568_v8, %v2572_v9  ;;  %v3913_v16 = vcombine.low %v2568_v8, %v2572_v9 }
 0x32f   :  { %3355 = vmatpush1.bf16.msra.mxu1 %v3917_v12  ;;  %v2576_v12 = vld [vmem:[%s5998_s5 + $0x318] sm:$0xff] }
 0x330   :  { %3356 = vmatprep.subr.bf16.mxu1 %v3926_v13  ;;  %v2580_v13 = vld [vmem:[%s5998_s5 + $0x338] sm:$0xff] }
 0x331   :  { %v3922_v17 = vcombine.high %v2576_v12, %v2580_v13  ;;  %v3921_v15 = vcombine.low %v2576_v12, %v2580_v13 }
 0x333   :  { %3357 = vmatpush1.bf16.msra.mxu1 %v3925_v18  ;;  %v2584_v18 = vld [vmem:[%s5998_s5 + $0x358] sm:$0xff] }
 0x334   :  { %3358 = vmatprep.subr.bf16.mxu1 %v3934_v14  ;;  %v2588_v14 = vld [vmem:[%s5998_s5 + $0x378] sm:$0xff] }
 0x335   :  { %v3930_v21 = vcombine.high %v2584_v18, %v2588_v14  ;;  %v3929_v24 = vcombine.low %v2584_v18, %v2588_v14 }
 0x337   :  { %3359 = vmatpush1.bf16.msra.mxu1 %v3933_v19  ;;  %v2592_v19 = vld [vmem:[%s5998_s5 + $0x398] sm:$0xff] }
 0x338   :  { %3360 = vmatprep.subr.bf16.mxu1 %v3942_v20  ;;  %v2596_v20 = vld [vmem:[%s5998_s5 + $0x3b8] sm:$0xff] }
 0x339   :  { %v3938_v25 = vcombine.high %v2592_v19, %v2596_v20  ;;  %v3937_v28 = vcombine.low %v2592_v19, %v2596_v20 }
 0x33b   :  { %3361 = vmatpush1.bf16.msra.mxu1 %v3941_v26  ;;  %v2600_v26 = vld [vmem:[%s5998_s5 + $0x3d8] sm:$0xff] }
 0x33c   :  { %3416 = vmatprep.subr.bf16.mxu1 %v3826_v27  ;;  %v2604_v27 = vld [vmem:[%s5998_s5 + $0x3f8] sm:$0xff] }
 0x33d   :  { %v3946_v29 = vcombine.high %v2600_v26, %v2604_v27 }
 0x33e   :  { %3363 = vmatmul.mubr.bf16.vlgmr.msra.gmra.mrb[8].mxu1 %v5776_v22 }
 0x33f   :  { %3417 = vmatpush1.bf16.msra.mxu1 %v3825_v30  ;;  %3448 = vmatprep.mubr.bf16.mxu1 %v5778_v23  ;;  %v2516_v23 = vld [vmem:[%s5998_s5 + $0x138] sm:$0xff]  ;;  %v3945_v30 = vcombine.low %v2600_v26, %v2604_v27  ;;  %s4494_s5 = smov [#allocation2]  }
 0x340   :  { %3418 = vmatprep.subr.bf16.mxu1 %v3834_v31  ;;  %v3858_v47 = vcombine.high %v2512_v45, %v2516_v23  ;;  %v3857_v50 = vcombine.low %v2512_v45, %v2516_v23  ;;  %v2625_v31 = vsub.s32 4, %v5524_v32  ;;  %s3480_s6 = sshll.u32 %s4494_s5, 4  ;;  %s3481_s6 = int_to_ptr.vmem [resolvable:$true] %s3480_s6 }
 0x341   :  { %s4470_s11 = scalar_lea.vmem %s3481_s6, 2048  ;;  %p4475_p1 = scmp.lt.s32.totalorder %s3481_s6, %s3481_s6 }
 0x342   :  { %p4471_p0 = scmp.ne.s32.totalorder %s3481_s6, %s4470_s11  ;;  %p4476_p2 = scmp.lt.s32.totalorder %s4470_s11, %s4470_s11 }
 0x343   :  { %3419 = vmatpush1.bf16.msra.mxu1 %v3833_v35  ;;  %v2610_v35 = vrot.slane %v2605_v33, %v5533_v37 }
 0x344   :  { %3420 = vmatprep.subr.bf16.mxu1 %v3842_v36  ;;  %v2626_v36 = vrot.slane %v2605_v33, %v2625_v31  ;;  %p4477_p3 = por %p4476_p2, %p4475_p1 }
 0x346   :  { %p4478_p4 = pnand %p4477_p3, %p4471_p0 }
 0x347   :  { %3421 = vmatpush1.bf16.msra.mxu1 %v3841_v43 }
 0x348   :  { %3422 = vmatprep.subr.bf16.mxu1 %v3850_v44 }
 0x34b   :  { %3423 = vmatpush1.bf16.msra.mxu1 %v3849_v46 }
 0x34c   :  { %3424 = vmatprep.subr.bf16.mxu1 %v3858_v47 }
 0x34f   :  { %3425 = vmatpush1.bf16.msra.mxu1 %v3857_v50 }
 0x350   :  { %3426 = vmatprep.subr.bf16.mxu1 %v3866_v51 }
 0x353   :  { %3427 = vmatpush1.bf16.msra.mxu1 %v3865_v54 }
 0x354   :  { %3428 = vmatprep.subr.bf16.mxu1 %v3874_v55  ;;  %v2618_v55 = vrot.slane %v2605_v33, %v303_v38  ;;  %v2634_v38 = vrot.slane %v2605_v33, %v2633_v1 }
 0x357   :  { %3429 = vmatpush1.bf16.msra.mxu1 %v3873_v58 }
 0x358   :  { %3430 = vmatprep.subr.bf16.mxu1 %v3882_v59 }
 0x35b   :  { %3431 = vmatpush1.bf16.msra.mxu1 %v3881_v62 }
 0x35c   :  { %3432 = vmatprep.subr.bf16.mxu1 %v3890_v63 }
 0x35f   :  { %3433 = vmatpush1.bf16.msra.mxu1 %v3889_v2  ;;  %v2637_v2 = vsub.s32 7, %v5524_v32 }
 0x360   :  { %3434 = vmatprep.subr.bf16.mxu1 %v3898_v3 }
 0x361   :  { %v2638_v3 = vrot.slane %v2605_v33, %v2637_v2 }
 0x363   :  { %3435 = vmatpush1.bf16.msra.mxu1 %v3897_v6 }
 0x364   :  { %3436 = vmatprep.subr.bf16.mxu1 %v3906_v7 }
 0x367   :  { %3437 = vmatpush1.bf16.msra.mxu1 %v3905_v10 }
 0x368   :  { %3438 = vmatprep.subr.bf16.mxu1 %v3914_v11 }
 0x36b   :  { %3439 = vmatpush1.bf16.msra.mxu1 %v3913_v16 }
 0x36c   :  { %3440 = vmatprep.subr.bf16.mxu1 %v3922_v17 }
 0x36f   :  { %3441 = vmatpush1.bf16.msra.mxu1 %v3921_v15 }
 0x370   :  { %3442 = vmatprep.subr.bf16.mxu1 %v3930_v21 }
 0x373   :  { %3443 = vmatpush1.bf16.msra.mxu1 %v3929_v24 }
 0x374   :  { %3444 = vmatprep.subr.bf16.mxu1 %v3938_v25 }
 0x377   :  { %3445 = vmatpush1.bf16.msra.mxu1 %v3937_v28 }
 0x378   :  { %3446 = vmatprep.subr.bf16.mxu1 %v3946_v29 }
 0x37b   :  { %3447 = vmatpush1.bf16.msra.mxu1 %v3945_v30 }
 0x37e   :  { %3449 = vmatmul.mubr.bf16.vlgmr.msra.gmra.mrb[12].mxu1 %v5776_v22 }
 0x3d1   :  { %v3321_v43 = vpop.f32.mrb[4].mxu1  ;;  %v3407_v44 = vpop.f32.mrb[8].mxu0 }
 0x3d2   :  { %v3322_v45 = vadd.f32 %v3321_v43, %v2610_v35  ;;  %v3408_v23 = vadd.f32 %v3407_v44, %v2626_v36  ;;  %v3323_v46 = vpop.f32.mrb[5].mxu1  ;;  %v3409_v22 = vpop.f32.mrb[9].mxu0 }
 0x3d3   :  { %v3324_v47 = vadd.f32 %v3323_v46, %v2614_v39  ;;  %v3410_v48 = vadd.f32 %v3409_v22, %v2630_v40  ;;  %v3325_v49 = vpop.f32.mrb[6].mxu1  ;;  %v3411_v50 = vpop.f32.mrb[10].mxu0 }
 0x3d4   :  { %3459 = vst [vmem:[#allocation2] sm:$0xff] %v3322_v45  ;;  %3463 = vst [vmem:[#allocation2 + $0x20] sm:$0xff] %v3408_v23  ;;  %v3326_v51 = vadd.f32 %v3325_v49, %v2610_v35  ;;  %v3412_v52 = vadd.f32 %v3411_v50, %v2626_v36  ;;  %v3327_v53 = vpop.f32.mrb[7].mxu1  ;;  %v3413_v37 = vpop.f32.mrb[11].mxu0 }
 0x3d5   :  { %3460 = vst [vmem:[#allocation2 + $0x8] sm:$0xff] %v3324_v47  ;;  %3464 = vst [vmem:[#allocation2 + $0x28] sm:$0xff] %v3410_v48  ;;  %v3328_v41 = vadd.f32 %v3327_v53, %v2614_v39  ;;  %v3414_v54 = vadd.f32 %v3413_v37, %v2630_v40 }
 0x3d6   :  { %3467 = vst [vmem:[#allocation2 + $0x40] sm:$0xff] %v3326_v51  ;;  %3471 = vst [vmem:[#allocation2 + $0x60] sm:$0xff] %v3412_v52 }
 0x3d7   :  { %3468 = vst [vmem:[#allocation2 + $0x48] sm:$0xff] %v3328_v41  ;;  %3472 = vst [vmem:[#allocation2 + $0x68] sm:$0xff] %v3414_v54 }
 0x411   :  { %v3364_v57 = vpop.f32.mrb[8].mxu1 }
 0x412   :  { %v3365_v58 = vadd.f32 %v3364_v57, %v2618_v55  ;;  %v3366_v59 = vpop.f32.mrb[9].mxu1 }
 0x413   :  { %v3367_v60 = vadd.f32 %v3366_v59, %v2622_v56  ;;  %v3368_v61 = vpop.f32.mrb[10].mxu1 }
 0x414   :  { %3461 = vst [vmem:[#allocation2 + $0x10] sm:$0xff] %v3365_v58  ;;  %v3369_v62 = vadd.f32 %v3368_v61, %v2618_v55  ;;  %v3370_v63 = vpop.f32.mrb[11].mxu1 }
 0x415   :  { %3462 = vst [vmem:[#allocation2 + $0x18] sm:$0xff] %v3367_v60  ;;  %v3371_v0 = vadd.f32 %v3370_v63, %v2622_v56 }
 0x416   :  { %3469 = vst [vmem:[#allocation2 + $0x50] sm:$0xff] %v3369_v62 }
 0x417   :  { %3470 = vst [vmem:[#allocation2 + $0x58] sm:$0xff] %v3371_v0 }
 0x451   :  { %v3450_v4 = vpop.f32.mrb[12].mxu1 }
 0x452   :  { %v3451_v42 = vadd.f32 %v3450_v4, %v2634_v38  ;;  %v3452_v5 = vpop.f32.mrb[13].mxu1 }
 0x453   :  { %v3453_v6 = vadd.f32 %v3452_v5, %v2638_v3  ;;  %v3454_v7 = vpop.f32.mrb[14].mxu1 }
 0x454   :  { %3465 = vst [vmem:[#allocation2 + $0x30] sm:$0xff] %v3451_v42  ;;  %v3455_v8 = vadd.f32 %v3454_v7, %v2634_v38  ;;  %v3456_v9 = vpop.f32.mrb[15].mxu1 }
 0x455   :  { %3466 = vst [vmem:[#allocation2 + $0x38] sm:$0xff] %v3453_v6  ;;  %v3457_v10 = vadd.f32 %v3456_v9, %v2638_v3 }
 0x456   :  { %3473 = vst [vmem:[#allocation2 + $0x70] sm:$0xff] %v3455_v8 }
 0x457   :  { %3474 = vst [vmem:[#allocation2 + $0x78] sm:$0xff] %v3457_v10 }
 0x458   :  { %4481 = shalt.err (!%p4478_p4)
}
 0x459   :  { %s4482_s13 = scalar_lea.hbm %s6000_s7, 2048 }
 0x45a   :  { %p4483_p5 = scmp.ne.s32.totalorder %s6000_s7, %s4482_s13  ;;  %p4486_p6 = scmp.lt.u32.totalorder %s4482_s13, %s6000_s7 }
 0x45c   :  { %p4488_p7 = pnand %p4486_p6, %p4483_p5 }
 0x45e   :  { %4491 = shalt.err (!%p4488_p7)
}
 0x45f   :  { %s4495_s17 = smov 1024   ;;  %s4496_s18 = smov 64  }
 0x460   :  { %3486 = dma.vmem_to_hbm [thread:$0]  %s3481_s6, 2048, %s6000_s7, [#allocation3], %s4495_s17, %s4495_s17, %s4496_s18  }
 0x461   :  { %4492 = dma.done.wait [#allocation3], 2048  }
 0x462   :  { %4493 = vsyncadd [#allocation3], 4294965248 }
 0x463   :  { %3490 = vsyncpa [#allocation3], 1 }

</bundles_post_ra>
